<compile_context>
chip_gen: v7x
topology: tpu7x:2x2x1
jax: 0.10.0
libtpu: 0.0.40
codegen_flags: <defaults>
</compile_context>

<pallas_src>
import jax
import jax.numpy as jnp
from jax.experimental import pallas as pl
from jax.experimental.pallas import tpu as pltpu

SN_EPS = 1e-12


# ---------------------------------------------------------------------------
# Pallas kernel: fused SiLU + 2x2 phase split + block-diagonal 1x1 conv + bias
# ---------------------------------------------------------------------------
def _make_kernel(tr, wo):
    def kernel(x_ref, w_ref, b_ref, s_ref, o_ref):
        # x_ref: (Cin, 2*tr, W)  raw NCHW rows of this (image, row-tile)
        # w_ref: (Cout, 4*Cin)   block-diagonal, spectrally-normalised weights
        # b_ref: (Cout, 1)       concatenated conv biases
        # s_ref: (W, 2*Wo)       0/1 column-selection matrix [even cols | odd cols]
        # o_ref: (Cout, tr*Wo)   flattened output rows (lane-dense NCHW slab)
        w = w_ref[...]
        s = s_ref[...]
        b = b_ref[...]
        for i in range(tr):                                   # static unroll over rows
            xe = x_ref[:, 2 * i, :].astype(jnp.float32)       # even input row (Cin, W)
            xo = x_ref[:, 2 * i + 1, :].astype(jnp.float32)   # odd  input row (Cin, W)
            xe = xe * jax.nn.sigmoid(xe)                      # SiLU (EUP slot)
            xo = xo * jax.nn.sigmoid(xo)
            # column compaction on the MXU: [:, :Wo] = even cols, [:, Wo:] = odd cols
            ce = jnp.dot(xe, s, preferred_element_type=jnp.float32)   # (Cin, 2*Wo)
            co = jnp.dot(xo, s, preferred_element_type=jnp.float32)   # (Cin, 2*Wo)
            # phase-major stack matching conv_1..conv_4 = (0,0),(1,1),(0,1),(1,0)
            xg = jnp.concatenate(
                [ce[:, :wo], co[:, wo:], ce[:, wo:], co[:, :wo]], axis=0)  # (4Cin, Wo)
            y = jnp.dot(w, xg, preferred_element_type=jnp.float32) + b     # (Cout, Wo)
            o_ref[:, i * wo:(i + 1) * wo] = y.astype(o_ref.dtype)
    return kernel


def _pick_row_tile(ho, wo, c_in, c_out, width, itemsize):
    """Largest output-row tile whose double-buffered blocks fit a safe VMEM budget.

    Shape-legality: tr == Ho (blocks equal the full dims), or tr % 4 == 0
    (2*tr multiple of 8 sublanes) and (tr*Wo) % 128 == 0 (lane-dense output block).
    """
    budget = 8 << 20                                   # fits every gen's scoped VMEM
    per_row = 2 * itemsize * (2 * c_in * width + c_out * wo)   # dbl-buffered in + out
    cap = max(1, min(budget // max(per_row, 1), 64, ho))
    if cap >= ho:
        return ho
    t = cap - (cap % 4)
    while t >= 4:
        if (t * wo) % 128 == 0:
            return t
        t -= 4
    return ho


# ---------------------------------------------------------------------------
# Glue: spectral norm (tiny matvecs) and the pallas_call wrapper
# ---------------------------------------------------------------------------
def spectral_normalize(weight, u, n_power_iterations=1):
    """PyTorch nn.utils.spectral_norm forward-time normalization (training)."""
    c_out = weight.shape[0]
    w_mat = weight.reshape(c_out, -1)

    def _norm(v):
        return v / (jnp.linalg.norm(v) + SN_EPS)

    v = None
    for _ in range(n_power_iterations):
        v = _norm(w_mat.T @ u)
        u = _norm(w_mat @ v)
    sigma = u @ (w_mat @ v)
    # TODO(synk): PyTorch also writes the updated power-iteration vector `u` back into
    # the module buffer (stateful); a pure forward cannot persist it.
    return weight / sigma


def factorized_reduce(x, conv_params):
    """FactorizedReduce forward.

    x:           (N, Cin, H, W) NCHW, H and W even.
    conv_params: list of 4 tuples (weight (r_i, Cin, 1, 1), bias (r_i,), u (r_i,))
                 in conv_1 .. conv_4 order.
    Returns:     (N, Cout, H // 2, W // 2), NCHW, same dtype as x.
    """
    n, c_in, h, width = x.shape
    assert h % 2 == 0 and width % 2 == 0, "FactorizedReduce needs even spatial dims"
    ho, wo = h // 2, width // 2
    hw = ho * wo
    k_tot = 4 * c_in
    c_out = sum(int(wt.shape[0]) for wt, _, _ in conv_params)

    # Block-diagonal weight: conv_i -> rows [row_i, row_i+r_i), cols [i*Cin,(i+1)*Cin),
    # matching the in-kernel phase order (0,0),(1,1),(0,1),(1,0) = conv_1..conv_4.
    w_bd = jnp.zeros((c_out, k_tot), jnp.float32)
    biases = []
    row = 0
    for idx, (wt, bia, u) in enumerate(conv_params):
        sz = int(wt.shape[0])
        w_sn = spectral_normalize(wt.astype(jnp.float32), u.astype(jnp.float32))
        w_bd = w_bd.at[row:row + sz, idx * c_in:(idx + 1) * c_in].set(
            w_sn.reshape(sz, c_in))
        biases.append(bia.astype(jnp.float32))
        row += sz
    b_cat = jnp.concatenate(biases).reshape(c_out, 1)

    # 0/1 column-selection matrix: s_col[w, cp*Wo + j] = 1  iff  w == 2*j + cp.
    wi = jnp.arange(width)[:, None]
    jj = jnp.arange(wo)[None, :]
    s_col = jnp.concatenate(
        [(wi == 2 * jj).astype(jnp.float32), (wi == 2 * jj + 1).astype(jnp.float32)],
        axis=1)                                                     # (W, 2*Wo)

    tr = _pick_row_tile(ho, wo, c_in, c_out, width, x.dtype.itemsize)

    out = pl.pallas_call(
        _make_kernel(tr, wo),
        out_shape=jax.ShapeDtypeStruct((n, c_out, hw), x.dtype),
        grid=(n, pl.cdiv(ho, tr)),
        in_specs=[
            # x read straight from NCHW: one image, all channels, 2*tr input rows.
            pl.BlockSpec((None, c_in, 2 * tr, width), lambda b, r: (b, 0, r, 0)),
            pl.BlockSpec((c_out, k_tot), lambda b, r: (0, 0)),
            pl.BlockSpec((c_out, 1), lambda b, r: (0, 0)),
            pl.BlockSpec((width, 2 * wo), lambda b, r: (0, 0)),
        ],
        out_specs=pl.BlockSpec((None, c_out, tr * wo), lambda b, r: (b, 0, r)),
        compiler_params=pltpu.CompilerParams(
            dimension_semantics=("parallel", "parallel")),
    )(x, w_bd, b_cat, s_col)

    # Output is already channel-major (NCHW); this reshape is free (no data movement).
    return out.reshape(n, c_out, ho, wo)


# ---------------------------------------------------------------------------
# Pure-JAX reference (silent correctness check)
# ---------------------------------------------------------------------------
def _reference(x, conv_params):
    xs = jax.nn.silu(x)
    views = [xs, xs[:, :, 1:, 1:], xs[:, :, :, 1:], xs[:, :, 1:, :]]
    outs = []
    for xv, (wt, bia, u) in zip(views, conv_params):
        w_sn = spectral_normalize(wt, u)
        y = jax.lax.conv_general_dilated(
            xv, w_sn, window_strides=(2, 2), padding="VALID",
            dimension_numbers=("NCHW", "OIHW", "NCHW"))
        outs.append(y + bia.reshape(1, -1, 1, 1))
    return jnp.concatenate(outs, axis=1)


if __name__ == "__main__":
    key = jax.random.PRNGKey(0)
    keys = jax.random.split(key, 13)

    N, C_IN, H, W = 2, 4, 16, 16
    C_OUT = 8
    r = C_OUT // 4
    sizes = [r, r, r, C_OUT - 3 * r]          # conv_1..conv_4 output channels

    x = jax.random.normal(keys[0], (N, C_IN, H, W), jnp.float32)

    conv_params = []
    ki = 1
    for sz in sizes:
        wt = 0.5 * jax.random.normal(keys[ki], (sz, C_IN, 1, 1), jnp.float32)
        bia = 0.1 * jax.random.normal(keys[ki + 1], (sz,), jnp.float32)
        u = jax.random.normal(keys[ki + 2], (sz,), jnp.float32)
        u = u / (jnp.linalg.norm(u) + SN_EPS)  # spectral-norm power-iter vector
        conv_params.append((wt, bia, u))
        ki += 3

    out = jax.jit(factorized_reduce)(x, conv_params)
    out = jax.block_until_ready(out)

    ref = _reference(x, conv_params)
    assert out.shape == (N, C_OUT, H // 2, W // 2), out.shape
    assert jnp.allclose(out, ref, atol=1e-4, rtol=1e-4), \
        float(jnp.max(jnp.abs(out - ref)))

    print("KERNEL_OK")
</pallas_src>

<mosaic_0001>
module attributes {stable_mosaic.version = 11 : i64} {
  func.func @kernel(%arg0: i32, %arg1: i32, %arg2: memref<1x4x16x16xf32, #tpu.memory_space<vmem>>, %arg3: memref<8x16xf32, #tpu.memory_space<vmem>>, %arg4: memref<8x1xf32, #tpu.memory_space<vmem>>, %arg5: memref<16x16xf32, #tpu.memory_space<vmem>>, %arg6: memref<1x8x64xf32, #tpu.memory_space<vmem>>) attributes {dimension_semantics = [#tpu.dimension_semantics<parallel>, #tpu.dimension_semantics<parallel>], iteration_bounds = array<i64: 2, 1>, scalar_prefetch = 0 : i64, scratch_operands = 0 : i64, tpu.core_type = #tpu.core_type<tc>, window_params = [{transform_indices = @transform_0, window_bounds = array<i64: 1, 4, 16, 16>}, {pipeline_mode = #tpu.pipeline_mode<synchronous>, transform_indices = @transform_1, window_bounds = array<i64: 8, 16>}, {pipeline_mode = #tpu.pipeline_mode<synchronous>, transform_indices = @transform_2, window_bounds = array<i64: 8, 1>}, {pipeline_mode = #tpu.pipeline_mode<synchronous>, transform_indices = @transform_3, window_bounds = array<i64: 16, 16>}, {transform_indices = @transform_4, window_bounds = array<i64: 1, 8, 64>}]} {
    %c0 = arith.constant 0 : index
    %c0_0 = arith.constant 0 : index
    %0 = vector.load %arg3[%c0, %c0_0] : memref<8x16xf32, #tpu.memory_space<vmem>>, vector<8x16xf32>
    %c0_1 = arith.constant 0 : index
    %c0_2 = arith.constant 0 : index
    %1 = vector.load %arg5[%c0_1, %c0_2] : memref<16x16xf32, #tpu.memory_space<vmem>>, vector<16x16xf32>
    %c0_3 = arith.constant 0 : index
    %c0_4 = arith.constant 0 : index
    %2 = vector.load %arg4[%c0_3, %c0_4] : memref<8x1xf32, #tpu.memory_space<vmem>>, vector<8x1xf32>
    %c0_5 = arith.constant 0 : index
    %c0_6 = arith.constant 0 : index
    %c0_7 = arith.constant 0 : index
    %c0_8 = arith.constant 0 : index
    %3 = vector.load %arg2[%c0_5, %c0_6, %c0_7, %c0_8] : memref<1x4x16x16xf32, #tpu.memory_space<vmem>>, vector<1x4x1x16xf32>
    %4 = vector.shape_cast %3 : vector<1x4x1x16xf32> to vector<4x16xf32>
    %c0_9 = arith.constant 0 : index
    %c0_10 = arith.constant 0 : index
    %c1 = arith.constant 1 : index
    %c0_11 = arith.constant 0 : index
    %5 = vector.load %arg2[%c0_9, %c0_10, %c1, %c0_11] : memref<1x4x16x16xf32, #tpu.memory_space<vmem>>, vector<1x4x1x16xf32>
    %6 = vector.shape_cast %5 : vector<1x4x1x16xf32> to vector<4x16xf32>
    %7 = arith.negf %4 : vector<4x16xf32>
    %8 = math.exp %7 : vector<4x16xf32>
    %cst = arith.constant 1.000000e+00 : f32
    %9 = vector.broadcast %cst : f32 to vector<4x16xf32>
    %10 = arith.addf %9, %8 : vector<4x16xf32>
    %11 = arith.divf %9, %10 : vector<4x16xf32>
    %12 = arith.mulf %4, %11 : vector<4x16xf32>
    %13 = arith.negf %6 : vector<4x16xf32>
    %14 = math.exp %13 : vector<4x16xf32>
    %cst_12 = arith.constant 1.000000e+00 : f32
    %15 = vector.broadcast %cst_12 : f32 to vector<4x16xf32>
    %16 = arith.addf %15, %14 : vector<4x16xf32>
    %17 = arith.divf %15, %16 : vector<4x16xf32>
    %18 = arith.mulf %6, %17 : vector<4x16xf32>
    %cst_13 = arith.constant dense<0.000000e+00> : vector<4x16xf32>
    %19 = tpu.matmul %12, %1, %cst_13 {dimension_numbers = #tpu.dot_dimension_numbers<[1], [0], [0], [1], [0, 0, 1, 1], [], []>} : vector<4x16xf32>, vector<16x16xf32>, vector<4x16xf32> -> vector<4x16xf32>
    %cst_14 = arith.constant dense<0.000000e+00> : vector<4x16xf32>
    %20 = tpu.matmul %18, %1, %cst_14 {dimension_numbers = #tpu.dot_dimension_numbers<[1], [0], [0], [1], [0, 0, 1, 1], [], []>} : vector<4x16xf32>, vector<16x16xf32>, vector<4x16xf32> -> vector<4x16xf32>
    %21 = vector.extract_strided_slice %19 {offsets = [0, 0], sizes = [4, 8], strides = [1, 1]} : vector<4x16xf32> to vector<4x8xf32>
    %22 = vector.extract_strided_slice %20 {offsets = [0, 8], sizes = [4, 8], strides = [1, 1]} : vector<4x16xf32> to vector<4x8xf32>
    %23 = vector.extract_strided_slice %19 {offsets = [0, 8], sizes = [4, 8], strides = [1, 1]} : vector<4x16xf32> to vector<4x8xf32>
    %24 = vector.extract_strided_slice %20 {offsets = [0, 0], sizes = [4, 8], strides = [1, 1]} : vector<4x16xf32> to vector<4x8xf32>
    %25 = tpu.concatenate %21, %22, %23, %24 in 0 : vector<4x8xf32>, vector<4x8xf32>, vector<4x8xf32>, vector<4x8xf32> -> vector<16x8xf32>
    %cst_15 = arith.constant dense<0.000000e+00> : vector<8x8xf32>
    %26 = tpu.matmul %0, %25, %cst_15 {dimension_numbers = #tpu.dot_dimension_numbers<[1], [0], [0], [1], [0, 0, 1, 1], [], []>} : vector<8x16xf32>, vector<16x8xf32>, vector<8x8xf32> -> vector<8x8xf32>
    %27 = vector.broadcast %2 : vector<8x1xf32> to vector<8x8xf32>
    %28 = arith.addf %26, %27 : vector<8x8xf32>
    %c0_16 = arith.constant 0 : index
    %c0_17 = arith.constant 0 : index
    %c0_18 = arith.constant 0 : index
    %29 = vector.load %arg6[%c0_16, %c0_17, %c0_18] : memref<1x8x64xf32, #tpu.memory_space<vmem>>, vector<1x8x8xf32>
    %30 = vector.shape_cast %29 : vector<1x8x8xf32> to vector<8x8xf32>
    %31 = vector.shape_cast %28 : vector<8x8xf32> to vector<1x8x8xf32>
    tpu.vector_store %arg6[%c0_16, %c0_17, %c0_18], %31 {strides = array<i32>} : memref<1x8x64xf32, #tpu.memory_space<vmem>>, vector<1x8x8xf32>,
    %c0_19 = arith.constant 0 : index
    %c0_20 = arith.constant 0 : index
    %c2 = arith.constant 2 : index
    %c0_21 = arith.constant 0 : index
    %32 = vector.load %arg2[%c0_19, %c0_20, %c2, %c0_21] : memref<1x4x16x16xf32, #tpu.memory_space<vmem>>, vector<1x4x1x16xf32>
    %33 = vector.shape_cast %32 : vector<1x4x1x16xf32> to vector<4x16xf32>
    %c0_22 = arith.constant 0 : index
    %c0_23 = arith.constant 0 : index
    %c3 = arith.constant 3 : index
    %c0_24 = arith.constant 0 : index
    %34 = vector.load %arg2[%c0_22, %c0_23, %c3, %c0_24] : memref<1x4x16x16xf32, #tpu.memory_space<vmem>>, vector<1x4x1x16xf32>
    %35 = vector.shape_cast %34 : vector<1x4x1x16xf32> to vector<4x16xf32>
    %36 = arith.negf %33 : vector<4x16xf32>
    %37 = math.exp %36 : vector<4x16xf32>
    %cst_25 = arith.constant 1.000000e+00 : f32
    %38 = vector.broadcast %cst_25 : f32 to vector<4x16xf32>
    %39 = arith.addf %38, %37 : vector<4x16xf32>
    %40 = arith.divf %38, %39 : vector<4x16xf32>
    %41 = arith.mulf %33, %40 : vector<4x16xf32>
    %42 = arith.negf %35 : vector<4x16xf32>
    %43 = math.exp %42 : vector<4x16xf32>
    %cst_26 = arith.constant 1.000000e+00 : f32
    %44 = vector.broadcast %cst_26 : f32 to vector<4x16xf32>
    %45 = arith.addf %44, %43 : vector<4x16xf32>
    %46 = arith.divf %44, %45 : vector<4x16xf32>
    %47 = arith.mulf %35, %46 : vector<4x16xf32>
    %cst_27 = arith.constant dense<0.000000e+00> : vector<4x16xf32>
    %48 = tpu.matmul %41, %1, %cst_27 {dimension_numbers = #tpu.dot_dimension_numbers<[1], [0], [0], [1], [0, 0, 1, 1], [], []>} : vector<4x16xf32>, vector<16x16xf32>, vector<4x16xf32> -> vector<4x16xf32>
    %cst_28 = arith.constant dense<0.000000e+00> : vector<4x16xf32>
    %49 = tpu.matmul %47, %1, %cst_28 {dimension_numbers = #tpu.dot_dimension_numbers<[1], [0], [0], [1], [0, 0, 1, 1], [], []>} : vector<4x16xf32>, vector<16x16xf32>, vector<4x16xf32> -> vector<4x16xf32>
    %50 = vector.extract_strided_slice %48 {offsets = [0, 0], sizes = [4, 8], strides = [1, 1]} : vector<4x16xf32> to vector<4x8xf32>
    %51 = vector.extract_strided_slice %49 {offsets = [0, 8], sizes = [4, 8], strides = [1, 1]} : vector<4x16xf32> to vector<4x8xf32>
    %52 = vector.extract_strided_slice %48 {offsets = [0, 8], sizes = [4, 8], strides = [1, 1]} : vector<4x16xf32> to vector<4x8xf32>
    %53 = vector.extract_strided_slice %49 {offsets = [0, 0], sizes = [4, 8], strides = [1, 1]} : vector<4x16xf32> to vector<4x8xf32>
    %54 = tpu.concatenate %50, %51, %52, %53 in 0 : vector<4x8xf32>, vector<4x8xf32>, vector<4x8xf32>, vector<4x8xf32> -> vector<16x8xf32>
    %cst_29 = arith.constant dense<0.000000e+00> : vector<8x8xf32>
    %55 = tpu.matmul %0, %54, %cst_29 {dimension_numbers = #tpu.dot_dimension_numbers<[1], [0], [0], [1], [0, 0, 1, 1], [], []>} : vector<8x16xf32>, vector<16x8xf32>, vector<8x8xf32> -> vector<8x8xf32>
    %56 = vector.broadcast %2 : vector<8x1xf32> to vector<8x8xf32>
    %57 = arith.addf %55, %56 : vector<8x8xf32>
    %c0_30 = arith.constant 0 : index
    %c0_31 = arith.constant 0 : index
    %c8 = arith.constant 8 : index
    %58 = vector.load %arg6[%c0_30, %c0_31, %c8] : memref<1x8x64xf32, #tpu.memory_space<vmem>>, vector<1x8x8xf32>
    %59 = vector.shape_cast %58 : vector<1x8x8xf32> to vector<8x8xf32>
    %60 = vector.shape_cast %57 : vector<8x8xf32> to vector<1x8x8xf32>
    tpu.vector_store %arg6[%c0_30, %c0_31, %c8], %60 {strides = array<i32>} : memref<1x8x64xf32, #tpu.memory_space<vmem>>, vector<1x8x8xf32>,
    %c0_32 = arith.constant 0 : index
    %c0_33 = arith.constant 0 : index
    %c4 = arith.constant 4 : index
    %c0_34 = arith.constant 0 : index
    %61 = vector.load %arg2[%c0_32, %c0_33, %c4, %c0_34] : memref<1x4x16x16xf32, #tpu.memory_space<vmem>>, vector<1x4x1x16xf32>
    %62 = vector.shape_cast %61 : vector<1x4x1x16xf32> to vector<4x16xf32>
    %c0_35 = arith.constant 0 : index
    %c0_36 = arith.constant 0 : index
    %c5 = arith.constant 5 : index
    %c0_37 = arith.constant 0 : index
    %63 = vector.load %arg2[%c0_35, %c0_36, %c5, %c0_37] : memref<1x4x16x16xf32, #tpu.memory_space<vmem>>, vector<1x4x1x16xf32>
    %64 = vector.shape_cast %63 : vector<1x4x1x16xf32> to vector<4x16xf32>
    %65 = arith.negf %62 : vector<4x16xf32>
    %66 = math.exp %65 : vector<4x16xf32>
    %cst_38 = arith.constant 1.000000e+00 : f32
    %67 = vector.broadcast %cst_38 : f32 to vector<4x16xf32>
    %68 = arith.addf %67, %66 : vector<4x16xf32>
    %69 = arith.divf %67, %68 : vector<4x16xf32>
    %70 = arith.mulf %62, %69 : vector<4x16xf32>
    %71 = arith.negf %64 : vector<4x16xf32>
    %72 = math.exp %71 : vector<4x16xf32>
    %cst_39 = arith.constant 1.000000e+00 : f32
    %73 = vector.broadcast %cst_39 : f32 to vector<4x16xf32>
    %74 = arith.addf %73, %72 : vector<4x16xf32>
    %75 = arith.divf %73, %74 : vector<4x16xf32>
    %76 = arith.mulf %64, %75 : vector<4x16xf32>
    %cst_40 = arith.constant dense<0.000000e+00> : vector<4x16xf32>
    %77 = tpu.matmul %70, %1, %cst_40 {dimension_numbers = #tpu.dot_dimension_numbers<[1], [0], [0], [1], [0, 0, 1, 1], [], []>} : vector<4x16xf32>, vector<16x16xf32>, vector<4x16xf32> -> vector<4x16xf32>
    %cst_41 = arith.constant dense<0.000000e+00> : vector<4x16xf32>
    %78 = tpu.matmul %76, %1, %cst_41 {dimension_numbers = #tpu.dot_dimension_numbers<[1], [0], [0], [1], [0, 0, 1, 1], [], []>} : vector<4x16xf32>, vector<16x16xf32>, vector<4x16xf32> -> vector<4x16xf32>
    %79 = vector.extract_strided_slice %77 {offsets = [0, 0], sizes = [4, 8], strides = [1, 1]} : vector<4x16xf32> to vector<4x8xf32>
    %80 = vector.extract_strided_slice %78 {offsets = [0, 8], sizes = [4, 8], strides = [1, 1]} : vector<4x16xf32> to vector<4x8xf32>
    %81 = vector.extract_strided_slice %77 {offsets = [0, 8], sizes = [4, 8], strides = [1, 1]} : vector<4x16xf32> to vector<4x8xf32>
    %82 = vector.extract_strided_slice %78 {offsets = [0, 0], sizes = [4, 8], strides = [1, 1]} : vector<4x16xf32> to vector<4x8xf32>
    %83 = tpu.concatenate %79, %80, %81, %82 in 0 : vector<4x8xf32>, vector<4x8xf32>, vector<4x8xf32>, vector<4x8xf32> -> vector<16x8xf32>
    %cst_42 = arith.constant dense<0.000000e+00> : vector<8x8xf32>
    %84 = tpu.matmul %0, %83, %cst_42 {dimension_numbers = #tpu.dot_dimension_numbers<[1], [0], [0], [1], [0, 0, 1, 1], [], []>} : vector<8x16xf32>, vector<16x8xf32>, vector<8x8xf32> -> vector<8x8xf32>
    %85 = vector.broadcast %2 : vector<8x1xf32> to vector<8x8xf32>
    %86 = arith.addf %84, %85 : vector<8x8xf32>
    %c0_43 = arith.constant 0 : index
    %c0_44 = arith.constant 0 : index
    %c16 = arith.constant 16 : index
    %87 = vector.load %arg6[%c0_43, %c0_44, %c16] : memref<1x8x64xf32, #tpu.memory_space<vmem>>, vector<1x8x8xf32>
    %88 = vector.shape_cast %87 : vector<1x8x8xf32> to vector<8x8xf32>
    %89 = vector.shape_cast %86 : vector<8x8xf32> to vector<1x8x8xf32>
    tpu.vector_store %arg6[%c0_43, %c0_44, %c16], %89 {strides = array<i32>} : memref<1x8x64xf32, #tpu.memory_space<vmem>>, vector<1x8x8xf32>,
    %c0_45 = arith.constant 0 : index
    %c0_46 = arith.constant 0 : index
    %c6 = arith.constant 6 : index
    %c0_47 = arith.constant 0 : index
    %90 = vector.load %arg2[%c0_45, %c0_46, %c6, %c0_47] : memref<1x4x16x16xf32, #tpu.memory_space<vmem>>, vector<1x4x1x16xf32>
    %91 = vector.shape_cast %90 : vector<1x4x1x16xf32> to vector<4x16xf32>
    %c0_48 = arith.constant 0 : index
    %c0_49 = arith.constant 0 : index
    %c7 = arith.constant 7 : index
    %c0_50 = arith.constant 0 : index
    %92 = vector.load %arg2[%c0_48, %c0_49, %c7, %c0_50] : memref<1x4x16x16xf32, #tpu.memory_space<vmem>>, vector<1x4x1x16xf32>
    %93 = vector.shape_cast %92 : vector<1x4x1x16xf32> to vector<4x16xf32>
    %94 = arith.negf %91 : vector<4x16xf32>
    %95 = math.exp %94 : vector<4x16xf32>
    %cst_51 = arith.constant 1.000000e+00 : f32
    %96 = vector.broadcast %cst_51 : f32 to vector<4x16xf32>
    %97 = arith.addf %96, %95 : vector<4x16xf32>
    %98 = arith.divf %96, %97 : vector<4x16xf32>
    %99 = arith.mulf %91, %98 : vector<4x16xf32>
    %100 = arith.negf %93 : vector<4x16xf32>
    %101 = math.exp %100 : vector<4x16xf32>
    %cst_52 = arith.constant 1.000000e+00 : f32
    %102 = vector.broadcast %cst_52 : f32 to vector<4x16xf32>
    %103 = arith.addf %102, %101 : vector<4x16xf32>
    %104 = arith.divf %102, %103 : vector<4x16xf32>
    %105 = arith.mulf %93, %104 : vector<4x16xf32>
    %cst_53 = arith.constant dense<0.000000e+00> : vector<4x16xf32>
    %106 = tpu.matmul %99, %1, %cst_53 {dimension_numbers = #tpu.dot_dimension_numbers<[1], [0], [0], [1], [0, 0, 1, 1], [], []>} : vector<4x16xf32>, vector<16x16xf32>, vector<4x16xf32> -> vector<4x16xf32>
    %cst_54 = arith.constant dense<0.000000e+00> : vector<4x16xf32>
    %107 = tpu.matmul %105, %1, %cst_54 {dimension_numbers = #tpu.dot_dimension_numbers<[1], [0], [0], [1], [0, 0, 1, 1], [], []>} : vector<4x16xf32>, vector<16x16xf32>, vector<4x16xf32> -> vector<4x16xf32>
    %108 = vector.extract_strided_slice %106 {offsets = [0, 0], sizes = [4, 8], strides = [1, 1]} : vector<4x16xf32> to vector<4x8xf32>
    %109 = vector.extract_strided_slice %107 {offsets = [0, 8], sizes = [4, 8], strides = [1, 1]} : vector<4x16xf32> to vector<4x8xf32>
    %110 = vector.extract_strided_slice %106 {offsets = [0, 8], sizes = [4, 8], strides = [1, 1]} : vector<4x16xf32> to vector<4x8xf32>
    %111 = vector.extract_strided_slice %107 {offsets = [0, 0], sizes = [4, 8], strides = [1, 1]} : vector<4x16xf32> to vector<4x8xf32>
    %112 = tpu.concatenate %108, %109, %110, %111 in 0 : vector<4x8xf32>, vector<4x8xf32>, vector<4x8xf32>, vector<4x8xf32> -> vector<16x8xf32>
    %cst_55 = arith.constant dense<0.000000e+00> : vector<8x8xf32>
    %113 = tpu.matmul %0, %112, %cst_55 {dimension_numbers = #tpu.dot_dimension_numbers<[1], [0], [0], [1], [0, 0, 1, 1], [], []>} : vector<8x16xf32>, vector<16x8xf32>, vector<8x8xf32> -> vector<8x8xf32>
    %114 = vector.broadcast %2 : vector<8x1xf32> to vector<8x8xf32>
    %115 = arith.addf %113, %114 : vector<8x8xf32>
    %c0_56 = arith.constant 0 : index
    %c0_57 = arith.constant 0 : index
    %c24 = arith.constant 24 : index
    %116 = vector.load %arg6[%c0_56, %c0_57, %c24] : memref<1x8x64xf32, #tpu.memory_space<vmem>>, vector<1x8x8xf32>
    %117 = vector.shape_cast %116 : vector<1x8x8xf32> to vector<8x8xf32>
    %118 = vector.shape_cast %115 : vector<8x8xf32> to vector<1x8x8xf32>
    tpu.vector_store %arg6[%c0_56, %c0_57, %c24], %118 {strides = array<i32>} : memref<1x8x64xf32, #tpu.memory_space<vmem>>, vector<1x8x8xf32>,
    %c0_58 = arith.constant 0 : index
    %c0_59 = arith.constant 0 : index
    %c8_60 = arith.constant 8 : index
    %c0_61 = arith.constant 0 : index
    %119 = vector.load %arg2[%c0_58, %c0_59, %c8_60, %c0_61] : memref<1x4x16x16xf32, #tpu.memory_space<vmem>>, vector<1x4x1x16xf32>
    %120 = vector.shape_cast %119 : vector<1x4x1x16xf32> to vector<4x16xf32>
    %c0_62 = arith.constant 0 : index
    %c0_63 = arith.constant 0 : index
    %c9 = arith.constant 9 : index
    %c0_64 = arith.constant 0 : index
    %121 = vector.load %arg2[%c0_62, %c0_63, %c9, %c0_64] : memref<1x4x16x16xf32, #tpu.memory_space<vmem>>, vector<1x4x1x16xf32>
    %122 = vector.shape_cast %121 : vector<1x4x1x16xf32> to vector<4x16xf32>
    %123 = arith.negf %120 : vector<4x16xf32>
    %124 = math.exp %123 : vector<4x16xf32>
    %cst_65 = arith.constant 1.000000e+00 : f32
    %125 = vector.broadcast %cst_65 : f32 to vector<4x16xf32>
    %126 = arith.addf %125, %124 : vector<4x16xf32>
    %127 = arith.divf %125, %126 : vector<4x16xf32>
    %128 = arith.mulf %120, %127 : vector<4x16xf32>
    %129 = arith.negf %122 : vector<4x16xf32>
    %130 = math.exp %129 : vector<4x16xf32>
    %cst_66 = arith.constant 1.000000e+00 : f32
    %131 = vector.broadcast %cst_66 : f32 to vector<4x16xf32>
    %132 = arith.addf %131, %130 : vector<4x16xf32>
    %133 = arith.divf %131, %132 : vector<4x16xf32>
    %134 = arith.mulf %122, %133 : vector<4x16xf32>
    %cst_67 = arith.constant dense<0.000000e+00> : vector<4x16xf32>
    %135 = tpu.matmul %128, %1, %cst_67 {dimension_numbers = #tpu.dot_dimension_numbers<[1], [0], [0], [1], [0, 0, 1, 1], [], []>} : vector<4x16xf32>, vector<16x16xf32>, vector<4x16xf32> -> vector<4x16xf32>
    %cst_68 = arith.constant dense<0.000000e+00> : vector<4x16xf32>
    %136 = tpu.matmul %134, %1, %cst_68 {dimension_numbers = #tpu.dot_dimension_numbers<[1], [0], [0], [1], [0, 0, 1, 1], [], []>} : vector<4x16xf32>, vector<16x16xf32>, vector<4x16xf32> -> vector<4x16xf32>
    %137 = vector.extract_strided_slice %135 {offsets = [0, 0], sizes = [4, 8], strides = [1, 1]} : vector<4x16xf32> to vector<4x8xf32>
    %138 = vector.extract_strided_slice %136 {offsets = [0, 8], sizes = [4, 8], strides = [1, 1]} : vector<4x16xf32> to vector<4x8xf32>
    %139 = vector.extract_strided_slice %135 {offsets = [0, 8], sizes = [4, 8], strides = [1, 1]} : vector<4x16xf32> to vector<4x8xf32>
    %140 = vector.extract_strided_slice %136 {offsets = [0, 0], sizes = [4, 8], strides = [1, 1]} : vector<4x16xf32> to vector<4x8xf32>
    %141 = tpu.concatenate %137, %138, %139, %140 in 0 : vector<4x8xf32>, vector<4x8xf32>, vector<4x8xf32>, vector<4x8xf32> -> vector<16x8xf32>
    %cst_69 = arith.constant dense<0.000000e+00> : vector<8x8xf32>
    %142 = tpu.matmul %0, %141, %cst_69 {dimension_numbers = #tpu.dot_dimension_numbers<[1], [0], [0], [1], [0, 0, 1, 1], [], []>} : vector<8x16xf32>, vector<16x8xf32>, vector<8x8xf32> -> vector<8x8xf32>
    %143 = vector.broadcast %2 : vector<8x1xf32> to vector<8x8xf32>
    %144 = arith.addf %142, %143 : vector<8x8xf32>
    %c0_70 = arith.constant 0 : index
    %c0_71 = arith.constant 0 : index
    %c32 = arith.constant 32 : index
    %145 = vector.load %arg6[%c0_70, %c0_71, %c32] : memref<1x8x64xf32, #tpu.memory_space<vmem>>, vector<1x8x8xf32>
    %146 = vector.shape_cast %145 : vector<1x8x8xf32> to vector<8x8xf32>
    %147 = vector.shape_cast %144 : vector<8x8xf32> to vector<1x8x8xf32>
    tpu.vector_store %arg6[%c0_70, %c0_71, %c32], %147 {strides = array<i32>} : memref<1x8x64xf32, #tpu.memory_space<vmem>>, vector<1x8x8xf32>,
    %c0_72 = arith.constant 0 : index
    %c0_73 = arith.constant 0 : index
    %c10 = arith.constant 10 : index
    %c0_74 = arith.constant 0 : index
    %148 = vector.load %arg2[%c0_72, %c0_73, %c10, %c0_74] : memref<1x4x16x16xf32, #tpu.memory_space<vmem>>, vector<1x4x1x16xf32>
    %149 = vector.shape_cast %148 : vector<1x4x1x16xf32> to vector<4x16xf32>
    %c0_75 = arith.constant 0 : index
    %c0_76 = arith.constant 0 : index
    %c11 = arith.constant 11 : index
    %c0_77 = arith.constant 0 : index
    %150 = vector.load %arg2[%c0_75, %c0_76, %c11, %c0_77] : memref<1x4x16x16xf32, #tpu.memory_space<vmem>>, vector<1x4x1x16xf32>
    %151 = vector.shape_cast %150 : vector<1x4x1x16xf32> to vector<4x16xf32>
    %152 = arith.negf %149 : vector<4x16xf32>
    %153 = math.exp %152 : vector<4x16xf32>
    %cst_78 = arith.constant 1.000000e+00 : f32
    %154 = vector.broadcast %cst_78 : f32 to vector<4x16xf32>
    %155 = arith.addf %154, %153 : vector<4x16xf32>
    %156 = arith.divf %154, %155 : vector<4x16xf32>
    %157 = arith.mulf %149, %156 : vector<4x16xf32>
    %158 = arith.negf %151 : vector<4x16xf32>
    %159 = math.exp %158 : vector<4x16xf32>
    %cst_79 = arith.constant 1.000000e+00 : f32
    %160 = vector.broadcast %cst_79 : f32 to vector<4x16xf32>
    %161 = arith.addf %160, %159 : vector<4x16xf32>
    %162 = arith.divf %160, %161 : vector<4x16xf32>
    %163 = arith.mulf %151, %162 : vector<4x16xf32>
    %cst_80 = arith.constant dense<0.000000e+00> : vector<4x16xf32>
    %164 = tpu.matmul %157, %1, %cst_80 {dimension_numbers = #tpu.dot_dimension_numbers<[1], [0], [0], [1], [0, 0, 1, 1], [], []>} : vector<4x16xf32>, vector<16x16xf32>, vector<4x16xf32> -> vector<4x16xf32>
    %cst_81 = arith.constant dense<0.000000e+00> : vector<4x16xf32>
    %165 = tpu.matmul %163, %1, %cst_81 {dimension_numbers = #tpu.dot_dimension_numbers<[1], [0], [0], [1], [0, 0, 1, 1], [], []>} : vector<4x16xf32>, vector<16x16xf32>, vector<4x16xf32> -> vector<4x16xf32>
    %166 = vector.extract_strided_slice %164 {offsets = [0, 0], sizes = [4, 8], strides = [1, 1]} : vector<4x16xf32> to vector<4x8xf32>
    %167 = vector.extract_strided_slice %165 {offsets = [0, 8], sizes = [4, 8], strides = [1, 1]} : vector<4x16xf32> to vector<4x8xf32>
    %168 = vector.extract_strided_slice %164 {offsets = [0, 8], sizes = [4, 8], strides = [1, 1]} : vector<4x16xf32> to vector<4x8xf32>
    %169 = vector.extract_strided_slice %165 {offsets = [0, 0], sizes = [4, 8], strides = [1, 1]} : vector<4x16xf32> to vector<4x8xf32>
    %170 = tpu.concatenate %166, %167, %168, %169 in 0 : vector<4x8xf32>, vector<4x8xf32>, vector<4x8xf32>, vector<4x8xf32> -> vector<16x8xf32>
    %cst_82 = arith.constant dense<0.000000e+00> : vector<8x8xf32>
    %171 = tpu.matmul %0, %170, %cst_82 {dimension_numbers = #tpu.dot_dimension_numbers<[1], [0], [0], [1], [0, 0, 1, 1], [], []>} : vector<8x16xf32>, vector<16x8xf32>, vector<8x8xf32> -> vector<8x8xf32>
    %172 = vector.broadcast %2 : vector<8x1xf32> to vector<8x8xf32>
    %173 = arith.addf %171, %172 : vector<8x8xf32>
    %c0_83 = arith.constant 0 : index
    %c0_84 = arith.constant 0 : index
    %c40 = arith.constant 40 : index
    %174 = vector.load %arg6[%c0_83, %c0_84, %c40] : memref<1x8x64xf32, #tpu.memory_space<vmem>>, vector<1x8x8xf32>
    %175 = vector.shape_cast %174 : vector<1x8x8xf32> to vector<8x8xf32>
    %176 = vector.shape_cast %173 : vector<8x8xf32> to vector<1x8x8xf32>
    tpu.vector_store %arg6[%c0_83, %c0_84, %c40], %176 {strides = array<i32>} : memref<1x8x64xf32, #tpu.memory_space<vmem>>, vector<1x8x8xf32>,
    %c0_85 = arith.constant 0 : index
    %c0_86 = arith.constant 0 : index
    %c12 = arith.constant 12 : index
    %c0_87 = arith.constant 0 : index
    %177 = vector.load %arg2[%c0_85, %c0_86, %c12, %c0_87] : memref<1x4x16x16xf32, #tpu.memory_space<vmem>>, vector<1x4x1x16xf32>
    %178 = vector.shape_cast %177 : vector<1x4x1x16xf32> to vector<4x16xf32>
    %c0_88 = arith.constant 0 : index
    %c0_89 = arith.constant 0 : index
    %c13 = arith.constant 13 : index
    %c0_90 = arith.constant 0 : index
    %179 = vector.load %arg2[%c0_88, %c0_89, %c13, %c0_90] : memref<1x4x16x16xf32, #tpu.memory_space<vmem>>, vector<1x4x1x16xf32>
    %180 = vector.shape_cast %179 : vector<1x4x1x16xf32> to vector<4x16xf32>
    %181 = arith.negf %178 : vector<4x16xf32>
    %182 = math.exp %181 : vector<4x16xf32>
    %cst_91 = arith.constant 1.000000e+00 : f32
    %183 = vector.broadcast %cst_91 : f32 to vector<4x16xf32>
    %184 = arith.addf %183, %182 : vector<4x16xf32>
    %185 = arith.divf %183, %184 : vector<4x16xf32>
    %186 = arith.mulf %178, %185 : vector<4x16xf32>
    %187 = arith.negf %180 : vector<4x16xf32>
    %188 = math.exp %187 : vector<4x16xf32>
    %cst_92 = arith.constant 1.000000e+00 : f32
    %189 = vector.broadcast %cst_92 : f32 to vector<4x16xf32>
    %190 = arith.addf %189, %188 : vector<4x16xf32>
    %191 = arith.divf %189, %190 : vector<4x16xf32>
    %192 = arith.mulf %180, %191 : vector<4x16xf32>
    %cst_93 = arith.constant dense<0.000000e+00> : vector<4x16xf32>
    %193 = tpu.matmul %186, %1, %cst_93 {dimension_numbers = #tpu.dot_dimension_numbers<[1], [0], [0], [1], [0, 0, 1, 1], [], []>} : vector<4x16xf32>, vector<16x16xf32>, vector<4x16xf32> -> vector<4x16xf32>
    %cst_94 = arith.constant dense<0.000000e+00> : vector<4x16xf32>
    %194 = tpu.matmul %192, %1, %cst_94 {dimension_numbers = #tpu.dot_dimension_numbers<[1], [0], [0], [1], [0, 0, 1, 1], [], []>} : vector<4x16xf32>, vector<16x16xf32>, vector<4x16xf32> -> vector<4x16xf32>
    %195 = vector.extract_strided_slice %193 {offsets = [0, 0], sizes = [4, 8], strides = [1, 1]} : vector<4x16xf32> to vector<4x8xf32>
    %196 = vector.extract_strided_slice %194 {offsets = [0, 8], sizes = [4, 8], strides = [1, 1]} : vector<4x16xf32> to vector<4x8xf32>
    %197 = vector.extract_strided_slice %193 {offsets = [0, 8], sizes = [4, 8], strides = [1, 1]} : vector<4x16xf32> to vector<4x8xf32>
    %198 = vector.extract_strided_slice %194 {offsets = [0, 0], sizes = [4, 8], strides = [1, 1]} : vector<4x16xf32> to vector<4x8xf32>
    %199 = tpu.concatenate %195, %196, %197, %198 in 0 : vector<4x8xf32>, vector<4x8xf32>, vector<4x8xf32>, vector<4x8xf32> -> vector<16x8xf32>
    %cst_95 = arith.constant dense<0.000000e+00> : vector<8x8xf32>
    %200 = tpu.matmul %0, %199, %cst_95 {dimension_numbers = #tpu.dot_dimension_numbers<[1], [0], [0], [1], [0, 0, 1, 1], [], []>} : vector<8x16xf32>, vector<16x8xf32>, vector<8x8xf32> -> vector<8x8xf32>
    %201 = vector.broadcast %2 : vector<8x1xf32> to vector<8x8xf32>
    %202 = arith.addf %200, %201 : vector<8x8xf32>
    %c0_96 = arith.constant 0 : index
    %c0_97 = arith.constant 0 : index
    %c48 = arith.constant 48 : index
    %203 = vector.load %arg6[%c0_96, %c0_97, %c48] : memref<1x8x64xf32, #tpu.memory_space<vmem>>, vector<1x8x8xf32>
    %204 = vector.shape_cast %203 : vector<1x8x8xf32> to vector<8x8xf32>
    %205 = vector.shape_cast %202 : vector<8x8xf32> to vector<1x8x8xf32>
    tpu.vector_store %arg6[%c0_96, %c0_97, %c48], %205 {strides = array<i32>} : memref<1x8x64xf32, #tpu.memory_space<vmem>>, vector<1x8x8xf32>,
    %c0_98 = arith.constant 0 : index
    %c0_99 = arith.constant 0 : index
    %c14 = arith.constant 14 : index
    %c0_100 = arith.constant 0 : index
    %206 = vector.load %arg2[%c0_98, %c0_99, %c14, %c0_100] : memref<1x4x16x16xf32, #tpu.memory_space<vmem>>, vector<1x4x1x16xf32>
    %207 = vector.shape_cast %206 : vector<1x4x1x16xf32> to vector<4x16xf32>
    %c0_101 = arith.constant 0 : index
    %c0_102 = arith.constant 0 : index
    %c15 = arith.constant 15 : index
    %c0_103 = arith.constant 0 : index
    %208 = vector.load %arg2[%c0_101, %c0_102, %c15, %c0_103] : memref<1x4x16x16xf32, #tpu.memory_space<vmem>>, vector<1x4x1x16xf32>
    %209 = vector.shape_cast %208 : vector<1x4x1x16xf32> to vector<4x16xf32>
    %210 = arith.negf %207 : vector<4x16xf32>
    %211 = math.exp %210 : vector<4x16xf32>
    %cst_104 = arith.constant 1.000000e+00 : f32
    %212 = vector.broadcast %cst_104 : f32 to vector<4x16xf32>
    %213 = arith.addf %212, %211 : vector<4x16xf32>
    %214 = arith.divf %212, %213 : vector<4x16xf32>
    %215 = arith.mulf %207, %214 : vector<4x16xf32>
    %216 = arith.negf %209 : vector<4x16xf32>
    %217 = math.exp %216 : vector<4x16xf32>
    %cst_105 = arith.constant 1.000000e+00 : f32
    %218 = vector.broadcast %cst_105 : f32 to vector<4x16xf32>
    %219 = arith.addf %218, %217 : vector<4x16xf32>
    %220 = arith.divf %218, %219 : vector<4x16xf32>
    %221 = arith.mulf %209, %220 : vector<4x16xf32>
    %cst_106 = arith.constant dense<0.000000e+00> : vector<4x16xf32>
    %222 = tpu.matmul %215, %1, %cst_106 {dimension_numbers = #tpu.dot_dimension_numbers<[1], [0], [0], [1], [0, 0, 1, 1], [], []>} : vector<4x16xf32>, vector<16x16xf32>, vector<4x16xf32> -> vector<4x16xf32>
    %cst_107 = arith.constant dense<0.000000e+00> : vector<4x16xf32>
    %223 = tpu.matmul %221, %1, %cst_107 {dimension_numbers = #tpu.dot_dimension_numbers<[1], [0], [0], [1], [0, 0, 1, 1], [], []>} : vector<4x16xf32>, vector<16x16xf32>, vector<4x16xf32> -> vector<4x16xf32>
    %224 = vector.extract_strided_slice %222 {offsets = [0, 0], sizes = [4, 8], strides = [1, 1]} : vector<4x16xf32> to vector<4x8xf32>
    %225 = vector.extract_strided_slice %223 {offsets = [0, 8], sizes = [4, 8], strides = [1, 1]} : vector<4x16xf32> to vector<4x8xf32>
    %226 = vector.extract_strided_slice %222 {offsets = [0, 8], sizes = [4, 8], strides = [1, 1]} : vector<4x16xf32> to vector<4x8xf32>
    %227 = vector.extract_strided_slice %223 {offsets = [0, 0], sizes = [4, 8], strides = [1, 1]} : vector<4x16xf32> to vector<4x8xf32>
    %228 = tpu.concatenate %224, %225, %226, %227 in 0 : vector<4x8xf32>, vector<4x8xf32>, vector<4x8xf32>, vector<4x8xf32> -> vector<16x8xf32>
    %cst_108 = arith.constant dense<0.000000e+00> : vector<8x8xf32>
    %229 = tpu.matmul %0, %228, %cst_108 {dimension_numbers = #tpu.dot_dimension_numbers<[1], [0], [0], [1], [0, 0, 1, 1], [], []>} : vector<8x16xf32>, vector<16x8xf32>, vector<8x8xf32> -> vector<8x8xf32>
    %230 = vector.broadcast %2 : vector<8x1xf32> to vector<8x8xf32>
    %231 = arith.addf %229, %230 : vector<8x8xf32>
    %c0_109 = arith.constant 0 : index
    %c0_110 = arith.constant 0 : index
    %c56 = arith.constant 56 : index
    %232 = vector.load %arg6[%c0_109, %c0_110, %c56] : memref<1x8x64xf32, #tpu.memory_space<vmem>>, vector<1x8x8xf32>
    %233 = vector.shape_cast %232 : vector<1x8x8xf32> to vector<8x8xf32>
    %234 = vector.shape_cast %231 : vector<8x8xf32> to vector<1x8x8xf32>
    tpu.vector_store %arg6[%c0_109, %c0_110, %c56], %234 {strides = array<i32>} : memref<1x8x64xf32, #tpu.memory_space<vmem>>, vector<1x8x8xf32>,
    return
  }
  func.func @transform_0(%arg0: i32, %arg1: i32) -> (i32, i32, i32, i32) {
    %c0_i32 = arith.constant 0 : i32
    %c0_i32_0 = arith.constant 0 : i32
    %c0_i32_1 = arith.constant 0 : i32
    return %arg0, %c0_i32, %arg1, %c0_i32_0 : i32, i32, i32, i32
  }
  func.func @transform_1(%arg0: i32, %arg1: i32) -> (i32, i32) {
    %c0_i32 = arith.constant 0 : i32
    %c0_i32_0 = arith.constant 0 : i32
    %c0_i32_1 = arith.constant 0 : i32
    return %c0_i32, %c0_i32_0 : i32, i32
  }
  func.func @transform_2(%arg0: i32, %arg1: i32) -> (i32, i32) {
    %c0_i32 = arith.constant 0 : i32
    %c0_i32_0 = arith.constant 0 : i32
    %c0_i32_1 = arith.constant 0 : i32
    return %c0_i32, %c0_i32_0 : i32, i32
  }
  func.func @transform_3(%arg0: i32, %arg1: i32) -> (i32, i32) {
    %c0_i32 = arith.constant 0 : i32
    %c0_i32_0 = arith.constant 0 : i32
    %c0_i32_1 = arith.constant 0 : i32
    return %c0_i32, %c0_i32_0 : i32, i32
  }
  func.func @transform_4(%arg0: i32, %arg1: i32) -> (i32, i32, i32) {
    %c0_i32 = arith.constant 0 : i32
    %c0_i32_0 = arith.constant 0 : i32
    return %arg0, %c0_i32, %arg1 : i32, i32, i32
  }
}

</mosaic_0001>

<bundles_post_ra>
// kernel: factorized_reduce.1
= control target key start
LH: loop header
LB: loop body
LE: loop exit
PB: predicated region body
PF: predicated region fallthrough
CT: control target
= control target key end

     0   :  { %s3656_s15 = smov 0   ;;  %s3658_s16 = smov 0   ;;  %s4027_s0 = inlined_call_operand.vmem [shape: f32[2,4,16,16], index: 0, kind: input, shape index: {}]   ;;  %s4028_s1 = inlined_call_operand.vmem [shape: f32[8,16], index: 1, kind: input, shape index: {}]   ;;  %s4029_s2 = inlined_call_operand.vmem [shape: f32[8,1], index: 2, kind: input, shape index: {}]   ;;  %s4030_s3 = inlined_call_operand.vmem [shape: f32[16,16], index: 3, kind: input, shape index: {}]   ;;  %s4031_s4 = inlined_call_operand.vmem [shape: f32[2,8,64], index: 4, kind: output, shape index: {}]  }
   0x1   :  { %s3660_s17 = smov 0  }
   0x2 LB: > { %s26_s18 = sadd.s32 1, %s3613_s16  ;;  %p2854_p0 = scmp.ge.s32.totalorder %s3617_s17, 1  ;;  %s3617_s17 = sphi %s3660_s17, %s14_s17   ;;  %s3613_s16 = sphi %s3658_s16, %s4033_s16   ;;  %s3609_s15 = sphi %s3656_s15, %s4032_s15  }
   0x3   : > { %p28_p1 = scmp.ge.s32.totalorder %s26_s18, 2  ;;  %p183_p2 = scmp.lt.s32.totalorder %s3617_s17, 3 }
   0x5   : > { %s4035_s18 = smov (%p28_p1, %s26_s18), 0  ;;  %p184_p3 = pnand %p2854_p0, %p183_p2 }
   0x6   : > { %v233_v0 = vld [vmem:[%s4030_s3] sm:$0xff] (!%p184_p3)  ;;  %v234_v1 = vld [vmem:[%s4030_s3 + $0x8] sm:$0xff] (!%p184_p3)  ;;  %p216_p4 = scmp.lt.s32.totalorder (!%p184_p3), %s3609_s15, 1  ;;  %v3619_v2 = vmov (!%p184_p3), 0.0|0.0   ;;  %vm3620_vm0 = vmmov (!%p184_p3), 0   ;;  %v3621_v4 = vmov (!%p184_p3), 0.0  }
   0x7   : > { %187 = sbr.rel (%p184_p3) target bundleno = 3124 (0xc34), region = 36  ;;  %3192 = vmatprep.subr.bf16.mxu1 (!%p184_p3), %v3619_v2  ;;  %3189 = vmatprep.subr.bf16.mxu0 (!%p184_p3), %v3619_v2  ;;  %v3682_v3 = vpack.c.bf16 (!%p184_p3), %v234_v1, %v233_v0  ;;  %vm305_vm1 = vcmask (!%p184_p3), 1041409   ;;  %vm308_vm2 = vcmask (!%p184_p3), 1042434   ;;  %vm311_vm3 = vcmask (!%p184_p3), 1043459   ;;  %s3622_s27 = smov (!%p184_p3), 120  }
   0x8   : > { %3032 = vmatprep.mubr.msk.f32.mxu1 (!%p184_p3), %vm3620_vm0, %v3621_v4  ;;  %3025 = vmatprep.mubr.msk.f32.mxu0 (!%p184_p3), %vm3620_vm0, %v3621_v4  ;;  %vm313_vm4 = vcmask (!%p184_p3), 130048   ;;  %vm478_vm5 = vcmask (!%p184_p3), 1043456   ;;  %vm559_vm6 = vcmask (!%p184_p3), 64512   ;;  %s3624_s12 = smov (!%p184_p3), 24   ;;  %s3625_s13 = smov (!%p184_p3), 40   ;;  %vm875_vm7 = vcmask (!%p184_p3), 130112  }
   0x9   : > { %3194 = vmatpush3.bf16.msra.mxu1 (!%p184_p3), %v3682_v3  ;;  %3191 = vmatpush3.bf16.msra.mxu0 (!%p184_p3), %v3682_v3  ;;  %s3626_s14 = smov (!%p184_p3), 8   ;;  %s3628_s19 = smov (!%p184_p3), 32   ;;  %vm1191_vm8 = vcmask (!%p184_p3), 195712   ;;  %vm1507_vm9 = vcmask (!%p184_p3), 261312   ;;  %vm1823_vm10 = vcmask (!%p184_p3), 326912   ;;  %vm2139_vm11 = vcmask (!%p184_p3), 392512  }
   0xa   : > { %3195 = vmatprep.subr.bf16.mxu0 (!%p184_p3), %v3619_v2  ;;  %3198 = vmatprep.subr.bf16.mxu1 (!%p184_p3), %v3619_v2  ;;  %s3629_s20 = smov (!%p184_p3), 48   ;;  %vm2455_vm12 = vcmask (!%p184_p3), 458112   ;;  %s3630_s21 = smov (!%p184_p3), 56   ;;  %vm2771_vm13 = vcmask (!%p184_p3), 523712  }
   0xe   : > { %s4037_s15 = smov (!%p216_p4, %s3609_s15), 1 }
   0xf   : > { %s2948_s23 = sshll.u32 %s4037_s15, 6  ;;  %s2857_s8 = sshll.u32 %s4037_s15, 3 }
  0x10   : > { %s3698_s26 = scalar_lea.vmem %s4027_s0, %s2948_s23  ;;  %s3998_s11 = scalar_lea.vmem %s4031_s4, %s2857_s8 }
  0x11   : > { %v240_v5 = vld [vmem:[%s3698_s26 + $0x1] sm:$0x1]  ;;  %v241_v6 = vld [vmem:[%s3698_s26 + $0x11] sm:$0x1]  ;;  %v236_v13 = vld [vmem:[%s3698_s26] sm:$0x1] }
  0x12   : > { %v242_v7 = vld [vmem:[%s3698_s26 + $0x21] sm:$0x1]  ;;  %v243_v8 = vld [vmem:[%s3698_s26 + $0x31] sm:$0x1]  ;;  %v2862_v9 = vmul.f32 -1.442695, %v240_v5 }
  0x13   : > { %v2863_v10 = vmul.f32 -1.442695, %v241_v6  ;;  %v2864_v11 = vmul.f32 -1.442695, %v242_v7  ;;  %v2865_v12 = vmul.f32 -1.442695, %v243_v8 }
  0x14   : > { %3338 = vpow2.f32 %v2862_v9  ;;  %v237_v14 = vld [vmem:[%s3698_s26 + $0x10] sm:$0x1]  ;;  %v238_v15 = vld [vmem:[%s3698_s26 + $0x20] sm:$0x1]  ;;  %v2858_v17 = vmul.f32 -1.442695, %v236_v13 }
  0x15   : > { %v239_v16 = vld [vmem:[%s3698_s26 + $0x30] sm:$0x1]  ;;  %3340 = vpow2.f32 %v2863_v10  ;;  %v2859_v18 = vmul.f32 -1.442695, %v237_v14  ;;  %v2860_v19 = vmul.f32 -1.442695, %v238_v15 }
  0x16   : > { %3342 = vpow2.f32 %v2864_v11  ;;  %v2861_v20 = vmul.f32 -1.442695, %v239_v16  ;;  %v562_v1 = vld [vmem:[%s3698_s26 + $0x12] sm:$0x1]  ;;  %s3627_s15 = smov 16  }
  0x17   : > { %3344 = vpow2.f32 %v2865_v12  ;;  %v2870_v9 = vmul.f32 -1.442695, %v562_v1 }
  0x18   : > { %3346 = vpow2.f32 %v2858_v17 }
  0x19   : > { %3348 = vpow2.f32 %v2859_v18 }
  0x1a   : > { %3350 = vpow2.f32 %v2860_v19 }
  0x1b   : > { %3352 = vpow2.f32 %v2861_v20 }
  0x1e   : > { %v3339_v21 = vpop.eup %3338 }
  0x1f   : > { %v3341_v22 = vpop.eup %3340  ;;  %v284_v23 = vadd.f32 1.0, %v3339_v21 }
  0x20   : > { %v3343_v24 = vpop.eup %3342  ;;  %v285_v25 = vadd.f32 1.0, %v3341_v22 }
  0x21   : > { %v3345_v26 = vpop.eup %3344  ;;  %v286_v27 = vadd.f32 1.0, %v3343_v24  ;;  %3354 = vrcp.f32 %v284_v23 }
  0x22   : > { %v3347_v28 = vpop.eup %3346  ;;  %v287_v29 = vadd.f32 1.0, %v3345_v26  ;;  %3356 = vrcp.f32 %v285_v25 }
  0x23   : > { %v3349_v30 = vpop.eup %3348  ;;  %3358 = vrcp.f32 %v286_v27  ;;  %v256_v31 = vadd.f32 1.0, %v3347_v28 }
  0x24   : > { %v3351_v32 = vpop.eup %3350  ;;  %3360 = vrcp.f32 %v287_v29  ;;  %v257_v33 = vadd.f32 1.0, %v3349_v30 }
  0x25   : > { %v3353_v34 = vpop.eup %3352  ;;  %v258_v35 = vadd.f32 1.0, %v3351_v32  ;;  %3362 = vrcp.f32 %v256_v31 }
  0x26   : > { %v259_v36 = vadd.f32 1.0, %v3353_v34  ;;  %3364 = vrcp.f32 %v257_v33 }
  0x27   : > { %3366 = vrcp.f32 %v258_v35 }
  0x28   : > { %3368 = vrcp.f32 %v259_v36 }
  0x2b   : > { %v3355_v37 = vpop.eup %3354 }
  0x2c   : > { %v3357_v38 = vpop.eup %3356  ;;  %v296_v40 = vmul.f32 %v3355_v37, %v240_v5  ;;  %v561_v5 = vld [vmem:[%s3698_s26 + $0x2] sm:$0x1] }
  0x2d   : > { %v3359_v39 = vpop.eup %3358  ;;  %v297_v41 = vmul.f32 %v3357_v38, %v241_v6  ;;  %v563_v6 = vld [vmem:[%s3698_s26 + $0x22] sm:$0x1] }
  0x2e   : > { %v3361_v42 = vpop.eup %3360  ;;  %v298_v43 = vmul.f32 %v3359_v39, %v242_v7  ;;  %v564_v7 = vld [vmem:[%s3698_s26 + $0x32] sm:$0x1]  ;;  %v2871_v10 = vmul.f32 -1.442695, %v563_v6 }
  0x2f   : > { %v3363_v44 = vpop.eup %3362  ;;  %v299_v45 = vmul.f32 %v3361_v42, %v243_v8  ;;  %v390_v46 = vrot.slane %v297_v41, 7  ;;  %v2869_v8 = vmul.f32 -1.442695, %v561_v5  ;;  %v2872_v11 = vmul.f32 -1.442695, %v564_v7 }
  0x30   : > { %v3365_v47 = vpop.eup %3364  ;;  %v392_v48 = vrot.slane %v298_v43, 6  ;;  %v268_v52 = vmul.f32 %v3363_v44, %v236_v13  ;;  %v567_v41 = vld [vmem:[%s3698_s26 + $0x23] sm:$0x1]  ;;  %v568_v44 = vld [vmem:[%s3698_s26 + $0x33] sm:$0x1] }
  0x31   : > { %v3367_v49 = vpop.eup %3366  ;;  %v391_v50 = vsel %vm305_vm1, %v390_v46, %v296_v40  ;;  %v394_v51 = vrot.slane %v299_v45, 5  ;;  %v269_v53 = vmul.f32 %v3365_v47, %v237_v14  ;;  %3370 = vpow2.f32 %v2869_v8  ;;  %v566_v40 = vld [vmem:[%s3698_s26 + $0x13] sm:$0x1]  ;;  %v565_v43 = vld [vmem:[%s3698_s26 + $0x3] sm:$0x1] }
  0x32   : > { %v3369_v54 = vpop.eup %3368  ;;  %v393_v55 = vsel %vm308_vm2, %v392_v48, %v391_v50  ;;  %v270_v56 = vmul.f32 %v3367_v49, %v238_v15  ;;  %3372 = vpow2.f32 %v2870_v9  ;;  %v2874_v42 = vmul.f32 -1.442695, %v566_v40 }
  0x33   : > { %v395_v57 = vsel %vm311_vm3, %v394_v51, %v393_v55  ;;  %v271_v58 = vmul.f32 %v3369_v54, %v239_v16  ;;  %v304_v59 = vrot.slane %v269_v53, 7  ;;  %3374 = vpow2.f32 %v2871_v10 }
  0x34   : > { %3033 = vmatmul.mubr.msk.f32.vlgmr.msra.gmra.mrb[0].mxu1 %vm313_vm4, %v395_v57  ;;  %v307_v60 = vrot.slane %v270_v56, 6  ;;  %3376 = vpow2.f32 %v2872_v11  ;;  %v2875_v45 = vmul.f32 -1.442695, %v567_v41  ;;  %v2873_v46 = vmul.f32 -1.442695, %v565_v43 }
  0x35   : > { %v306_v61 = vsel %vm305_vm1, %v304_v59, %v268_v52  ;;  %v310_v62 = vrot.slane %v271_v58, 5  ;;  %3200 = vmatpush3.bf16.msra.mxu1 %v3682_v3  ;;  %3046 = vmatprep.mubr.msk.f32.mxu1 %vm3620_vm0, %v3621_v4  ;;  %v2876_v47 = vmul.f32 -1.442695, %v568_v44 }
  0x36   : > { %v309_v63 = vsel %vm308_vm2, %v307_v60, %v306_v61  ;;  %3204 = vmatprep.subr.bf16.mxu1 %v3619_v2 }
  0x37   : > { %v312_v0 = vsel %vm311_vm3, %v310_v62, %v309_v63 }
  0x38   : > { %3026 = vmatmul.mubr.msk.f32.vlgmr.msra.gmra.mrb[0].mxu0 %vm313_vm4, %v312_v0 }
  0x39   : > { %3039 = vmatprep.mubr.msk.f32.mxu0 %vm3620_vm0, %v3621_v4 }
  0x3b   : > { %v3371_v12 = vpop.eup %3370 }
  0x3c   : > { %v3373_v13 = vpop.eup %3372  ;;  %v581_v14 = vadd.f32 1.0, %v3371_v12  ;;  %v3746_v12 = vld [vmem:[%s4028_s1] sm:$0xff] }
  0x3d   : > { %v3375_v15 = vpop.eup %3374  ;;  %v582_v16 = vadd.f32 1.0, %v3373_v13 }
  0x3e   : > { %v3377_v17 = vpop.eup %3376  ;;  %v583_v18 = vadd.f32 1.0, %v3375_v15  ;;  %3378 = vrcp.f32 %v581_v14 }
  0x3f   : > { %v584_v19 = vadd.f32 1.0, %v3377_v17  ;;  %3380 = vrcp.f32 %v582_v16 }
  0x40   : > { %3382 = vrcp.f32 %v583_v18  ;;  %v878_v18 = vld [vmem:[%s3698_s26 + $0x14] sm:$0x1] }
  0x41   : > { %3384 = vrcp.f32 %v584_v19  ;;  %v877_v19 = vld [vmem:[%s3698_s26 + $0x4] sm:$0x1] }
  0x42   : > { %3386 = vpow2.f32 %v2874_v42 }
  0x43   : > { %3388 = vpow2.f32 %v2875_v45 }
  0x44   : > { %3390 = vpow2.f32 %v2873_v46 }
  0x45   : > { %3392 = vpow2.f32 %v2876_v47 }
  0x48   : > { %v3379_v23 = vpop.eup %3378 }
  0x49   : > { %v3381_v24 = vpop.eup %3380  ;;  %v593_v29 = vmul.f32 %v3379_v23, %v561_v5  ;;  %v2881_v23 = vmul.f32 -1.442695, %v878_v18 }
  0x4a   : > { %v3383_v26 = vpop.eup %3382  ;;  %v594_v30 = vmul.f32 %v3381_v24, %v562_v1 }
  0x4b   : > { %v3385_v31 = vpop.eup %3384  ;;  %v595_v32 = vmul.f32 %v3383_v26, %v563_v6 }
  0x4c   : > { %v596_v33 = vmul.f32 %v3385_v31, %v564_v7  ;;  %v629_v34 = vrot.slane %v594_v30, 7  ;;  %v3387_v48 = vpop.eup %3386 }
  0x4d   : > { %v631_v35 = vrot.slane %v595_v32, 6  ;;  %v3389_v49 = vpop.eup %3388  ;;  %v610_v50 = vadd.f32 1.0, %v3387_v48 }
  0x4e   : > { %v630_v36 = vsel %vm305_vm1, %v629_v34, %v593_v29  ;;  %v633_v37 = vrot.slane %v596_v33, 5  ;;  %v3391_v51 = vpop.eup %3390  ;;  %v611_v53 = vadd.f32 1.0, %v3389_v49 }
  0x4f   : > { %v632_v38 = vsel %vm308_vm2, %v631_v35, %v630_v36  ;;  %v3393_v52 = vpop.eup %3392  ;;  %v609_v54 = vadd.f32 1.0, %v3391_v51  ;;  %3394 = vrcp.f32 %v610_v50 }
  0x50   : > { %v634_v39 = vsel %vm311_vm3, %v633_v37, %v632_v38  ;;  %v612_v55 = vadd.f32 1.0, %v3393_v52  ;;  %3396 = vrcp.f32 %v611_v53 }
  0x51   : > { %3047 = vmatmul.mubr.msk.f32.vlgmr.msra.gmra.mrb[2].mxu1 %vm313_vm4, %v634_v39  ;;  %3398 = vrcp.f32 %v609_v54  ;;  %v882_v54 = vld [vmem:[%s3698_s26 + $0x15] sm:$0x1] }
  0x52   : > { %3060 = vmatprep.mubr.msk.f32.mxu1 %vm3620_vm0, %v3621_v4  ;;  %3400 = vrcp.f32 %v612_v55  ;;  %v883_v55 = vld [vmem:[%s3698_s26 + $0x25] sm:$0x1] }
  0x59   : > { %v3395_v56 = vpop.eup %3394 }
  0x5a   : > { %v3397_v57 = vpop.eup %3396  ;;  %v622_v58 = vmul.f32 %v3395_v56, %v566_v40  ;;  %v2885_v56 = vmul.f32 -1.442695, %v882_v54 }
  0x5b   : > { %v3399_v59 = vpop.eup %3398  ;;  %v623_v61 = vmul.f32 %v3397_v57, %v567_v41  ;;  %v881_v57 = vld [vmem:[%s3698_s26 + $0x5] sm:$0x1] }
  0x5c   : > { %v3401_v60 = vpop.eup %3400  ;;  %v621_v63 = vmul.f32 %v3399_v59, %v565_v43  ;;  %v711_v0 = vrot.slane %v622_v58, 7  ;;  %v884_v58 = vld [vmem:[%s3698_s26 + $0x35] sm:$0x1]  ;;  %v2886_v59 = vmul.f32 -1.442695, %v883_v55 }
  0x5d   : > { %v624_v6 = vmul.f32 %v3401_v60, %v568_v44  ;;  %v713_v9 = vrot.slane %v623_v61, 6  ;;  %v2884_v60 = vmul.f32 -1.442695, %v881_v57  ;;  %v2887_v61 = vmul.f32 -1.442695, %v884_v58 }
  0x5e   : > { %v712_v11 = vsel %vm305_vm1, %v711_v0, %v621_v63 }
  0x5f   : > { %v715_v13 = vrot.slane %v624_v6, 5  ;;  %v714_v14 = vsel %vm308_vm2, %v713_v9, %v712_v11 }
  0x61   : > { %v716_v15 = vsel %vm311_vm3, %v715_v13, %v714_v14 }
 0x107   : > { %v3726_v20 = vpop.f32.mrb[0].mxu1 }
 0x108   : > { %v469_v21 = vrot.slane %v3726_v20, 4  ;;  %v3034_v22 = vpop.f32.mrb[1].mxu1  ;;  %v879_v20 = vld [vmem:[%s3698_s26 + $0x24] sm:$0x1] }
 0x109   : > { %v2880_v22 = vmul.f32 -1.442695, %v877_v19  ;;  %v2882_v24 = vmul.f32 -1.442695, %v879_v20 }
 0x10b   : > { %v382_v25 = vpop.f32.mrb[0].mxu0  ;;  %3402 = vpow2.f32 %v2880_v22 }
 0x10c   : > { %v3027_v27 = vpop.f32.mrb[1].mxu0  ;;  %v3297_v28 = vpack.i.bf16 %v382_v25, %v469_v21  ;;  %3404 = vpow2.f32 %v2881_v23 }
 0x10d   : > { %3406 = vpow2.f32 %v2882_v24 }
 0x10e   : > { %3298 = vrot.lane.b32.xlu0 %v3297_v28, %s3622_s27 }
 0x115   : > { %v3403_v26 = vpop.eup %3402 }
 0x116   : > { %v3405_v27 = vpop.eup %3404  ;;  %v897_v28 = vadd.f32 1.0, %v3403_v26 }
 0x117   : > { %v3407_v29 = vpop.eup %3406  ;;  %v898_v30 = vadd.f32 1.0, %v3405_v27 }
 0x118   : > { %v899_v32 = vadd.f32 1.0, %v3407_v29 }
 0x124   : > { %v3762_v16 = vpop.f32.mrb[2].mxu1 }
 0x125   : > { %v3048_v17 = vpop.f32.mrb[3].mxu1 }
 0x180   : > { %v3299_v62 = vpop.permute.xlu0 %3298 }
 0x181   : > { %v3301_v1 = vunpack.i.h.bf16 %v3299_v62  ;;  %v3300_v5 = vunpack.i.l.bf16 %v3299_v62 }
 0x183   : > { %v480_v7 = vsel %vm478_vm5, %v3301_v1, %v469_v21  ;;  %v479_v8 = vsel %vm478_vm5, %v382_v25, %v3300_v5  ;;  %v880_v21 = vld [vmem:[%s3698_s26 + $0x34] sm:$0x1] }
 0x184   : > { %v3196_v10 = vpack.c.bf16 %v480_v7, %v479_v8  ;;  %v2883_v25 = vmul.f32 -1.442695, %v880_v21 }
 0x186   : > { %3197 = vmatpush3.bf16.msra.mxu0 %v3196_v10  ;;  %3408 = vpow2.f32 %v2883_v25 }
 0x187   : > { %3201 = vmatprep.subr.bf16.mxu0 %v3619_v2  ;;  %3410 = vrcp.f32 %v897_v28 }
 0x188   : > { %3412 = vrcp.f32 %v898_v30 }
 0x189   : > { %3040 = vmatmul.mubr.msk.f32.vlgmr.msra.gmra.mrb[2].mxu0 %vm313_vm4, %v3746_v12  ;;  %3414 = vrcp.f32 %v899_v32  ;;  %v1194_v32 = vld [vmem:[%s3698_s26 + $0x16] sm:$0x1] }
 0x18a   : > { %3203 = vmatpush3.bf16.msra.mxu0 %v3682_v3  ;;  %3053 = vmatprep.mubr.msk.f32.mxu0 %vm3620_vm0, %v3621_v4 }
 0x18b   : > { %3207 = vmatprep.subr.bf16.mxu0 %v3619_v2 }
 0x18d   : > { %3054 = vmatmul.mubr.msk.f32.vlgmr.msra.gmra.mrb[4].mxu0 %vm313_vm4, %v716_v15 }
 0x18e   : > { %3209 = vmatpush3.bf16.msra.mxu0 %v3682_v3  ;;  %3067 = vmatprep.mubr.msk.f32.mxu0 %vm3620_vm0, %v3621_v4 }
 0x18f   : > { %3213 = vmatprep.subr.bf16.mxu0 %v3619_v2 }
 0x190   : > { %v3409_v31 = vpop.eup %3408 }
 0x191   : > { %v900_v33 = vadd.f32 1.0, %v3409_v31  ;;  %v3411_v37 = vpop.eup %3410 }
 0x192   : > { %v3413_v40 = vpop.eup %3412  ;;  %v909_v43 = vmul.f32 %v3411_v37, %v877_v19 }
 0x193   : > { %3416 = vrcp.f32 %v900_v33  ;;  %v3415_v41 = vpop.eup %3414  ;;  %v910_v44 = vmul.f32 %v3413_v40, %v878_v18  ;;  %v1193_v33 = vld [vmem:[%s3698_s26 + $0x6] sm:$0x1] }
 0x194   : > { %v911_v46 = vmul.f32 %v3415_v41, %v879_v20  ;;  %3418 = vpow2.f32 %v2885_v56  ;;  %v2891_v37 = vmul.f32 -1.442695, %v1193_v33 }
 0x195   : > { %v945_v48 = vrot.slane %v910_v44, 7  ;;  %3420 = vpow2.f32 %v2886_v59 }
 0x196   : > { %v947_v49 = vrot.slane %v911_v46, 6  ;;  %3422 = vpow2.f32 %v2884_v60 }
 0x197   : > { %v946_v50 = vsel %vm305_vm1, %v945_v48, %v909_v43  ;;  %3424 = vpow2.f32 %v2887_v61 }
 0x198   : > { %v948_v52 = vsel %vm308_vm2, %v947_v49, %v946_v50 }
 0x19d   : > { %v3417_v45 = vpop.eup %3416 }
 0x19e   : > { %v912_v47 = vmul.f32 %v3417_v45, %v880_v21  ;;  %v3419_v62 = vpop.eup %3418 }
 0x19f   : > { %v3421_v63 = vpop.eup %3420  ;;  %v926_v0 = vadd.f32 1.0, %v3419_v62 }
 0x1a0   : > { %v949_v51 = vrot.slane %v912_v47, 5  ;;  %v3423_v1 = vpop.eup %3422  ;;  %v927_v6 = vadd.f32 1.0, %v3421_v63 }
 0x1a1   : > { %v3425_v5 = vpop.eup %3424  ;;  %v925_v7 = vadd.f32 1.0, %v3423_v1  ;;  %3426 = vrcp.f32 %v926_v0 }
 0x1a2   : > { %v950_v53 = vsel %vm311_vm3, %v949_v51, %v948_v52  ;;  %v928_v8 = vadd.f32 1.0, %v3425_v5  ;;  %3428 = vrcp.f32 %v927_v6 }
 0x1a3   : > { %3068 = vmatmul.mubr.msk.f32.vlgmr.msra.gmra.mrb[6].mxu0 %vm313_vm4, %v950_v53  ;;  %3430 = vrcp.f32 %v925_v7 }
 0x1a4   : > { %3081 = vmatprep.mubr.msk.f32.mxu0 %vm3620_vm0, %v3621_v4  ;;  %3432 = vrcp.f32 %v928_v8  ;;  %v1198_v8 = vld [vmem:[%s3698_s26 + $0x17] sm:$0x1] }
 0x1a5   : > { %3434 = vpow2.f32 %v2891_v37 }
 0x1ab   : > { %v3427_v9 = vpop.eup %3426 }
 0x1ac   : > { %v3429_v10 = vpop.eup %3428  ;;  %v938_v11 = vmul.f32 %v3427_v9, %v882_v54  ;;  %v1199_v9 = vld [vmem:[%s3698_s26 + $0x27] sm:$0x1] }
 0x1ad   : > { %v3431_v13 = vpop.eup %3430  ;;  %v939_v15 = vmul.f32 %v3429_v10, %v883_v55  ;;  %v2896_v10 = vmul.f32 -1.442695, %v1198_v8 }
 0x1ae   : > { %v3433_v14 = vpop.eup %3432  ;;  %v937_v18 = vmul.f32 %v3431_v13, %v881_v57  ;;  %v1027_v19 = vrot.slane %v938_v11, 7  ;;  %v1197_v11 = vld [vmem:[%s3698_s26 + $0x7] sm:$0x1]  ;;  %v1200_v13 = vld [vmem:[%s3698_s26 + $0x37] sm:$0x1] }
 0x1af   : > { %v940_v22 = vmul.f32 %v3433_v14, %v884_v58  ;;  %v1029_v25 = vrot.slane %v939_v15, 6  ;;  %v3435_v41 = vpop.eup %3434  ;;  %v2897_v14 = vmul.f32 -1.442695, %v1199_v9  ;;  %v2895_v15 = vmul.f32 -1.442695, %v1197_v11 }
 0x1b0   : > { %v1028_v27 = vsel %vm305_vm1, %v1027_v19, %v937_v18  ;;  %v1213_v43 = vadd.f32 1.0, %v3435_v41 }
 0x1b1   : > { %v1031_v28 = vrot.slane %v940_v22, 5  ;;  %v1030_v29 = vsel %vm308_vm2, %v1029_v25, %v1028_v27 }
 0x25c   : > { %v3768_v34 = vpop.f32.mrb[2].mxu0 }
 0x25d   : > { %v3041_v35 = vpop.f32.mrb[3].mxu0 }
 0x25e   : > { %v1195_v35 = vld [vmem:[%s3698_s26 + $0x26] sm:$0x1] }
 0x260   : > { %v785_v36 = vpop.f32.mrb[4].mxu0 }
 0x261   : > { %v790_v38 = vrot.slane %v785_v36, 4  ;;  %v3055_v39 = vpop.f32.mrb[5].mxu0  ;;  %v1196_v36 = vld [vmem:[%s3698_s26 + $0x36] sm:$0x1] }
 0x262   : > { %v2893_v39 = vmul.f32 -1.442695, %v1195_v35  ;;  %v2894_v40 = vmul.f32 -1.442695, %v1196_v36 }
 0x263   : > { %v3302_v42 = vpack.i.bf16 %v3762_v16, %v790_v38 }
 0x265   : > { %3303 = vrot.lane.b32.xlu0 %v3302_v42, %s3622_s27 }
 0x276   : > { %v3800_v30 = vpop.f32.mrb[6].mxu0 }
 0x277   : > { %v3069_v31 = vpop.f32.mrb[7].mxu0 }
 0x2d7   : > { %v3304_v17 = vpop.permute.xlu0 %3303 }
 0x2d8   : > { %v3306_v20 = vunpack.i.h.bf16 %v3304_v17  ;;  %v3305_v21 = vunpack.i.l.bf16 %v3304_v17  ;;  %v2898_v17 = vmul.f32 -1.442695, %v1200_v13 }
 0x2da   : > { %v800_v23 = vsel %vm478_vm5, %v3306_v20, %v790_v38  ;;  %v799_v24 = vsel %vm478_vm5, %v3762_v16, %v3305_v21  ;;  %v1032_v16 = vsel %vm311_vm3, %v1031_v28, %v1030_v29  ;;  %v2892_v38 = vmul.f32 -1.442695, %v1194_v32 }
 0x2db   : > { %v3205_v26 = vpack.c.bf16 %v800_v23, %v799_v24 }
 0x2dc   : > { %3436 = vpow2.f32 %v2892_v38 }
 0x2dd   : > { %3206 = vmatpush3.bf16.msra.mxu1 %v3205_v26  ;;  %3438 = vpow2.f32 %v2893_v39 }
 0x2de   : > { %3210 = vmatprep.subr.bf16.mxu1 %v3619_v2  ;;  %3440 = vpow2.f32 %v2894_v40 }
 0x2df   : > { %3442 = vrcp.f32 %v1213_v43 }
 0x2e0   : > { %3061 = vmatmul.mubr.msk.f32.vlgmr.msra.gmra.mrb[4].mxu1 %vm313_vm4, %v3746_v12 }
 0x2e1   : > { %3212 = vmatpush3.bf16.msra.mxu1 %v3682_v3  ;;  %3074 = vmatprep.mubr.msk.f32.mxu1 %vm3620_vm0, %v3621_v4 }
 0x2e2   : > { %3216 = vmatprep.subr.bf16.mxu1 %v3619_v2 }
 0x2e4   : > { %3075 = vmatmul.mubr.msk.f32.vlgmr.msra.gmra.mrb[6].mxu1 %vm313_vm4, %v1032_v16 }
 0x2e5   : > { %3218 = vmatpush3.bf16.msra.mxu1 %v3682_v3  ;;  %3088 = vmatprep.mubr.msk.f32.mxu1 %vm3620_vm0, %v3621_v4 }
 0x2e6   : > { %3222 = vmatprep.subr.bf16.mxu1 %v3619_v2  ;;  %v3437_v42 = vpop.eup %3436 }
 0x2e7   : > { %v3439_v44 = vpop.eup %3438  ;;  %v1214_v45 = vadd.f32 1.0, %v3437_v42 }
 0x2e8   : > { %v3441_v46 = vpop.eup %3440  ;;  %v1215_v47 = vadd.f32 1.0, %v3439_v44 }
 0x2e9   : > { %v1216_v48 = vadd.f32 1.0, %v3441_v46  ;;  %3444 = vrcp.f32 %v1214_v45  ;;  %v3443_v52 = vpop.eup %3442 }
 0x2ea   : > { %3446 = vrcp.f32 %v1215_v47  ;;  %v1225_v58 = vmul.f32 %v3443_v52, %v1193_v33  ;;  %v1512_v52 = vld [vmem:[%s3698_s26 + $0x38] sm:$0x1] }
 0x2eb   : > { %3448 = vrcp.f32 %v1216_v48  ;;  %v1510_v48 = vld [vmem:[%s3698_s26 + $0x18] sm:$0x1] }
 0x2ec   : > { %3450 = vpow2.f32 %v2896_v10 }
 0x2ed   : > { %3452 = vpow2.f32 %v2897_v14 }
 0x2ee   : > { %3454 = vpow2.f32 %v2895_v15 }
 0x2ef   : > { %3456 = vpow2.f32 %v2898_v17 }
 0x2f3   : > { %v3445_v55 = vpop.eup %3444 }
 0x2f4   : > { %v3447_v56 = vpop.eup %3446  ;;  %v1226_v59 = vmul.f32 %v3445_v55, %v1194_v32 }
 0x2f5   : > { %v3449_v60 = vpop.eup %3448  ;;  %v1227_v61 = vmul.f32 %v3447_v56, %v1195_v35  ;;  %v2905_v56 = vmul.f32 -1.442695, %v1512_v52 }
 0x2f6   : > { %v1228_v62 = vmul.f32 %v3449_v60, %v1196_v36  ;;  %v1261_v63 = vrot.slane %v1226_v59, 7  ;;  %v3451_v18 = vpop.eup %3450 }
 0x2f7   : > { %v1263_v0 = vrot.slane %v1227_v61, 6  ;;  %v3453_v19 = vpop.eup %3452  ;;  %v1242_v20 = vadd.f32 1.0, %v3451_v18 }
 0x2f8   : > { %v1262_v1 = vsel %vm305_vm1, %v1261_v63, %v1225_v58  ;;  %v1265_v5 = vrot.slane %v1228_v62, 5  ;;  %v3455_v21 = vpop.eup %3454  ;;  %v1243_v23 = vadd.f32 1.0, %v3453_v19 }
 0x2f9   : > { %v1264_v6 = vsel %vm308_vm2, %v1263_v0, %v1262_v1  ;;  %v3457_v22 = vpop.eup %3456  ;;  %v1241_v24 = vadd.f32 1.0, %v3455_v21  ;;  %3458 = vrcp.f32 %v1242_v20 }
 0x2fa   : > { %v1266_v7 = vsel %vm311_vm3, %v1265_v5, %v1264_v6  ;;  %v1244_v25 = vadd.f32 1.0, %v3457_v22  ;;  %3460 = vrcp.f32 %v1243_v23 }
 0x2fb   : > { %3089 = vmatmul.mubr.msk.f32.vlgmr.msra.gmra.mrb[8].mxu1 %vm313_vm4, %v1266_v7  ;;  %3462 = vrcp.f32 %v1241_v24 }
 0x2fc   : > { %3102 = vmatprep.mubr.msk.f32.mxu1 %vm3620_vm0, %v3621_v4  ;;  %3464 = vrcp.f32 %v1244_v25 }
 0x303   : > { %v3459_v26 = vpop.eup %3458 }
 0x304   : > { %v3461_v27 = vpop.eup %3460  ;;  %v1254_v28 = vmul.f32 %v3459_v26, %v1198_v8  ;;  %v1514_v26 = vld [vmem:[%s3698_s26 + $0x19] sm:$0x1] }
 0x305   : > { %v3463_v29 = vpop.eup %3462  ;;  %v1255_v31 = vmul.f32 %v3461_v27, %v1199_v9  ;;  %v1515_v27 = vld [vmem:[%s3698_s26 + $0x29] sm:$0x1] }
 0x306   : > { %v3465_v16 = vpop.eup %3464  ;;  %v1253_v33 = vmul.f32 %v3463_v29, %v1197_v11  ;;  %v1343_v35 = vrot.slane %v1254_v28, 7  ;;  %v2907_v28 = vmul.f32 -1.442695, %v1514_v26  ;;  %v1513_v29 = vld [vmem:[%s3698_s26 + $0x9] sm:$0x1] }
 0x307   : > { %v1256_v38 = vmul.f32 %v3465_v16, %v1200_v13  ;;  %v1345_v41 = vrot.slane %v1255_v31, 6  ;;  %v1516_v16 = vld [vmem:[%s3698_s26 + $0x39] sm:$0x1]  ;;  %v2908_v31 = vmul.f32 -1.442695, %v1515_v27 }
 0x308   : > { %v1344_v43 = vsel %vm305_vm1, %v1343_v35, %v1253_v33  ;;  %v2909_v33 = vmul.f32 -1.442695, %v1516_v16 }
 0x309   : > { %v1347_v44 = vrot.slane %v1256_v38, 5  ;;  %v1346_v45 = vsel %vm308_vm2, %v1345_v41, %v1344_v43 }
 0x3b3   : > { %v3806_v49 = vpop.f32.mrb[4].mxu1 }
 0x3b4   : > { %v3062_v50 = vpop.f32.mrb[5].mxu1 }
 0x3b5   : > { %v1509_v50 = vld [vmem:[%s3698_s26 + $0x8] sm:$0x1] }
 0x3b7   : > { %v1101_v51 = vpop.f32.mrb[6].mxu1 }
 0x3b8   : > { %v1106_v53 = vrot.slane %v1101_v51, 4  ;;  %v3076_v54 = vpop.f32.mrb[7].mxu1  ;;  %v1511_v51 = vld [vmem:[%s3698_s26 + $0x28] sm:$0x1] }
 0x3b9   : > { %v2903_v54 = vmul.f32 -1.442695, %v1510_v48  ;;  %v2904_v55 = vmul.f32 -1.442695, %v1511_v51 }
 0x3ba   : > { %v3307_v57 = vpack.i.bf16 %v3800_v30, %v1106_v53 }
 0x3bc   : > { %3308 = vrot.lane.b32.xlu1 %v3307_v57, %s3622_s27 }
 0x3ce   : > { %v3838_v46 = vpop.f32.mrb[8].mxu1 }
 0x3cf   : > { %v3090_v47 = vpop.f32.mrb[9].mxu1 }
 0x42e   : > { %v3309_v32 = vpop.permute.xlu1 %3308 }
 0x42f   : > { %v3311_v36 = vunpack.i.h.bf16 %v3309_v32  ;;  %v3310_v37 = vunpack.i.l.bf16 %v3309_v32  ;;  %v2906_v32 = vmul.f32 -1.442695, %v1513_v29 }
 0x431   : > { %v1116_v39 = vsel %vm478_vm5, %v3311_v36, %v1106_v53  ;;  %v1115_v40 = vsel %vm478_vm5, %v3800_v30, %v3310_v37  ;;  %v1348_v30 = vsel %vm311_vm3, %v1347_v44, %v1346_v45  ;;  %v2902_v53 = vmul.f32 -1.442695, %v1509_v50 }
 0x432   : > { %v3214_v42 = vpack.c.bf16 %v1116_v39, %v1115_v40 }
 0x433   : > { %3466 = vpow2.f32 %v2902_v53 }
 0x434   : > { %3215 = vmatpush3.bf16.msra.mxu0 %v3214_v42  ;;  %3468 = vpow2.f32 %v2903_v54 }
 0x435   : > { %3219 = vmatprep.subr.bf16.mxu0 %v3619_v2  ;;  %3470 = vpow2.f32 %v2904_v55 }
 0x436   : > { %3472 = vpow2.f32 %v2905_v56 }
 0x437   : > { %3082 = vmatmul.mubr.msk.f32.vlgmr.msra.gmra.mrb[8].mxu0 %vm313_vm4, %v3746_v12 }
 0x438   : > { %3221 = vmatpush3.bf16.msra.mxu0 %v3682_v3  ;;  %3095 = vmatprep.mubr.msk.f32.mxu0 %vm3620_vm0, %v3621_v4 }
 0x439   : > { %3225 = vmatprep.subr.bf16.mxu0 %v3619_v2 }
 0x43b   : > { %3096 = vmatmul.mubr.msk.f32.vlgmr.msra.gmra.mrb[10].mxu0 %vm313_vm4, %v1348_v30 }
 0x43c   : > { %3227 = vmatpush3.bf16.msra.mxu0 %v3682_v3  ;;  %3109 = vmatprep.mubr.msk.f32.mxu0 %vm3620_vm0, %v3621_v4 }
 0x43d   : > { %3231 = vmatprep.subr.bf16.mxu0 %v3619_v2  ;;  %v3467_v57 = vpop.eup %3466 }
 0x43e   : > { %v3469_v58 = vpop.eup %3468  ;;  %v1529_v59 = vadd.f32 1.0, %v3467_v57 }
 0x43f   : > { %v3471_v60 = vpop.eup %3470  ;;  %v1530_v61 = vadd.f32 1.0, %v3469_v58 }
 0x440   : > { %v3473_v62 = vpop.eup %3472  ;;  %v1531_v63 = vadd.f32 1.0, %v3471_v60  ;;  %3474 = vrcp.f32 %v1529_v59 }
 0x441   : > { %v1532_v0 = vadd.f32 1.0, %v3473_v62  ;;  %3476 = vrcp.f32 %v1530_v61 }
 0x442   : > { %3478 = vrcp.f32 %v1531_v63 }
 0x443   : > { %3480 = vrcp.f32 %v1532_v0 }
 0x444   : > { %3482 = vpow2.f32 %v2907_v28 }
 0x445   : > { %3484 = vpow2.f32 %v2908_v31 }
 0x446   : > { %3486 = vpow2.f32 %v2906_v32 }
 0x447   : > { %3488 = vpow2.f32 %v2909_v33 }
 0x44a   : > { %v3475_v7 = vpop.eup %3474 }
 0x44b   : > { %v3477_v10 = vpop.eup %3476  ;;  %v1541_v14 = vmul.f32 %v3475_v7, %v1509_v50  ;;  %v1827_v7 = vld [vmem:[%s3698_s26 + $0x2a] sm:$0x1] }
 0x44c   : > { %v3479_v11 = vpop.eup %3478  ;;  %v1542_v15 = vmul.f32 %v3477_v10, %v1510_v48 }
 0x44d   : > { %v3481_v17 = vpop.eup %3480  ;;  %v1543_v18 = vmul.f32 %v3479_v11, %v1511_v51  ;;  %v2915_v11 = vmul.f32 -1.442695, %v1827_v7 }
 0x44e   : > { %v1544_v19 = vmul.f32 %v3481_v17, %v1512_v52  ;;  %v1577_v20 = vrot.slane %v1542_v15, 7  ;;  %v3483_v35 = vpop.eup %3482 }
 0x44f   : > { %v1579_v21 = vrot.slane %v1543_v18, 6  ;;  %v3485_v36 = vpop.eup %3484  ;;  %v1558_v37 = vadd.f32 1.0, %v3483_v35 }
 0x450   : > { %v1578_v22 = vsel %vm305_vm1, %v1577_v20, %v1541_v14  ;;  %v1581_v23 = vrot.slane %v1544_v19, 5  ;;  %v3487_v38 = vpop.eup %3486  ;;  %v1559_v40 = vadd.f32 1.0, %v3485_v36 }
 0x451   : > { %v1580_v24 = vsel %vm308_vm2, %v1579_v21, %v1578_v22  ;;  %v3489_v39 = vpop.eup %3488  ;;  %v1557_v41 = vadd.f32 1.0, %v3487_v38  ;;  %3490 = vrcp.f32 %v1558_v37 }
 0x452   : > { %v1582_v25 = vsel %vm311_vm3, %v1581_v23, %v1580_v24  ;;  %v1560_v42 = vadd.f32 1.0, %v3489_v39  ;;  %3492 = vrcp.f32 %v1559_v40 }
 0x453   : > { %3110 = vmatmul.mubr.msk.f32.vlgmr.msra.gmra.mrb[12].mxu0 %vm313_vm4, %v1582_v25  ;;  %3494 = vrcp.f32 %v1557_v41 }
 0x454   : > { %3123 = vmatprep.mubr.msk.f32.mxu0 %vm3620_vm0, %v3621_v4  ;;  %3496 = vrcp.f32 %v1560_v42 }
 0x45b   : > { %v3491_v43 = vpop.eup %3490 }
 0x45c   : > { %v3493_v44 = vpop.eup %3492  ;;  %v1570_v45 = vmul.f32 %v3491_v43, %v1514_v26 }
 0x45d   : > { %v3495_v30 = vpop.eup %3494  ;;  %v1571_v48 = vmul.f32 %v3493_v44, %v1515_v27  ;;  %v1830_v44 = vld [vmem:[%s3698_s26 + $0x1b] sm:$0x1] }
 0x45e   : > { %v3497_v47 = vpop.eup %3496  ;;  %v1569_v51 = vmul.f32 %v3495_v30, %v1513_v29  ;;  %v1659_v52 = vrot.slane %v1570_v45, 7  ;;  %v1831_v45 = vld [vmem:[%s3698_s26 + $0x2b] sm:$0x1]  ;;  %v2918_v30 = vmul.f32 -1.442695, %v1830_v44 }
 0x45f   : > { %v1572_v55 = vmul.f32 %v3497_v47, %v1516_v16  ;;  %v1661_v58 = vrot.slane %v1571_v48, 6  ;;  %v1829_v47 = vld [vmem:[%s3698_s26 + $0xb] sm:$0x1]  ;;  %v1832_v48 = vld [vmem:[%s3698_s26 + $0x3b] sm:$0x1] }
 0x460   : > { %v1660_v60 = vsel %vm305_vm1, %v1659_v52, %v1569_v51  ;;  %v2917_v51 = vmul.f32 -1.442695, %v1829_v47  ;;  %v2920_v52 = vmul.f32 -1.442695, %v1832_v48 }
 0x461   : > { %v1663_v61 = vrot.slane %v1572_v55, 5  ;;  %v1662_v62 = vsel %vm308_vm2, %v1661_v58, %v1660_v60 }
 0x50a   : > { %v3844_v1 = vpop.f32.mrb[8].mxu0 }
 0x50b   : > { %v3083_v5 = vpop.f32.mrb[9].mxu0 }
 0x50c   : > { %v1826_v5 = vld [vmem:[%s3698_s26 + $0x1a] sm:$0x1] }
 0x50d   : > { %v2914_v10 = vmul.f32 -1.442695, %v1826_v5 }
 0x50e   : > { %v1417_v6 = vpop.f32.mrb[10].mxu0 }
 0x50f   : > { %v1422_v8 = vrot.slane %v1417_v6, 4  ;;  %v3097_v9 = vpop.f32.mrb[11].mxu0  ;;  %v1825_v6 = vld [vmem:[%s3698_s26 + $0xa] sm:$0x1] }
 0x510   : > { %v2913_v9 = vmul.f32 -1.442695, %v1825_v6 }
 0x511   : > { %v3312_v13 = vpack.i.bf16 %v3838_v46, %v1422_v8 }
 0x512   : > { %3498 = vpow2.f32 %v2913_v9 }
 0x513   : > { %3313 = vrot.lane.b32.xlu1 %v3312_v13, %s3622_s27  ;;  %3500 = vpow2.f32 %v2914_v10 }
 0x514   : > { %3502 = vpow2.f32 %v2915_v11 }
 0x51c   : > { %v3499_v14 = vpop.eup %3498 }
 0x51d   : > { %v3501_v15 = vpop.eup %3500  ;;  %v1845_v17 = vadd.f32 1.0, %v3499_v14 }
 0x51e   : > { %v3503_v18 = vpop.eup %3502  ;;  %v1846_v19 = vadd.f32 1.0, %v3501_v15 }
 0x51f   : > { %v1847_v21 = vadd.f32 1.0, %v3503_v18 }
 0x526   : > { %v3876_v63 = vpop.f32.mrb[12].mxu0 }
 0x527   : > { %v3111_v0 = vpop.f32.mrb[13].mxu0 }
 0x585   : > { %v3314_v50 = vpop.permute.xlu1 %3313 }
 0x586   : > { %v3316_v53 = vunpack.i.h.bf16 %v3314_v50  ;;  %v3315_v54 = vunpack.i.l.bf16 %v3314_v50  ;;  %v2919_v50 = vmul.f32 -1.442695, %v1831_v45 }
 0x588   : > { %v1432_v56 = vsel %vm478_vm5, %v3316_v53, %v1422_v8  ;;  %v1431_v57 = vsel %vm478_vm5, %v3838_v46, %v3315_v54  ;;  %v1664_v46 = vsel %vm311_vm3, %v1663_v61, %v1662_v62  ;;  %v1828_v8 = vld [vmem:[%s3698_s26 + $0x3a] sm:$0x1] }
 0x589   : > { %v3223_v59 = vpack.c.bf16 %v1432_v56, %v1431_v57  ;;  %v2916_v13 = vmul.f32 -1.442695, %v1828_v8 }
 0x58b   : > { %3224 = vmatpush3.bf16.msra.mxu1 %v3223_v59  ;;  %3504 = vpow2.f32 %v2916_v13 }
 0x58c   : > { %3228 = vmatprep.subr.bf16.mxu1 %v3619_v2  ;;  %3506 = vrcp.f32 %v1845_v17 }
 0x58d   : > { %3508 = vrcp.f32 %v1846_v19 }
 0x58e   : > { %3103 = vmatmul.mubr.msk.f32.vlgmr.msra.gmra.mrb[10].mxu1 %vm313_vm4, %v3746_v12  ;;  %3510 = vrcp.f32 %v1847_v21 }
 0x58f   : > { %3230 = vmatpush3.bf16.msra.mxu1 %v3682_v3  ;;  %3116 = vmatprep.mubr.msk.f32.mxu1 %vm3620_vm0, %v3621_v4 }
 0x590   : > { %3234 = vmatprep.subr.bf16.mxu1 %v3619_v2 }
 0x592   : > { %3117 = vmatmul.mubr.msk.f32.vlgmr.msra.gmra.mrb[12].mxu1 %vm313_vm4, %v1664_v46 }
 0x593   : > { %3236 = vmatpush3.bf16.msra.mxu1 %v3682_v3  ;;  %3130 = vmatprep.mubr.msk.f32.mxu1 %vm3620_vm0, %v3621_v4 }
 0x594   : > { %3240 = vmatprep.subr.bf16.mxu1 %v3619_v2 }
 0x595   : > { %v3505_v20 = vpop.eup %3504 }
 0x596   : > { %v1848_v22 = vadd.f32 1.0, %v3505_v20  ;;  %v3507_v26 = vpop.eup %3506 }
 0x597   : > { %v3509_v29 = vpop.eup %3508  ;;  %v1857_v32 = vmul.f32 %v3507_v26, %v1825_v6  ;;  %v2143_v26 = vld [vmem:[%s3698_s26 + $0x2c] sm:$0x1] }
 0x598   : > { %3512 = vrcp.f32 %v1848_v22  ;;  %v3511_v16 = vpop.eup %3510  ;;  %v1858_v33 = vmul.f32 %v3509_v29, %v1826_v5 }
 0x599   : > { %v1859_v36 = vmul.f32 %v3511_v16, %v1827_v7  ;;  %3514 = vpow2.f32 %v2918_v30  ;;  %v2926_v16 = vmul.f32 -1.442695, %v2143_v26 }
 0x59a   : > { %v1893_v38 = vrot.slane %v1858_v33, 7  ;;  %3516 = vpow2.f32 %v2919_v50 }
 0x59b   : > { %v1895_v39 = vrot.slane %v1859_v36, 6  ;;  %3518 = vpow2.f32 %v2917_v51 }
 0x59c   : > { %v1894_v40 = vsel %vm305_vm1, %v1893_v38, %v1857_v32  ;;  %3520 = vpow2.f32 %v2920_v52 }
 0x59d   : > { %v1896_v42 = vsel %vm308_vm2, %v1895_v39, %v1894_v40 }
 0x5a2   : > { %v3513_v35 = vpop.eup %3512 }
 0x5a3   : > { %v1860_v37 = vmul.f32 %v3513_v35, %v1828_v8  ;;  %v3515_v53 = vpop.eup %3514 }
 0x5a4   : > { %v3517_v54 = vpop.eup %3516  ;;  %v1874_v55 = vadd.f32 1.0, %v3515_v53 }
 0x5a5   : > { %v1897_v41 = vrot.slane %v1860_v37, 5  ;;  %v3519_v56 = vpop.eup %3518  ;;  %v1875_v58 = vadd.f32 1.0, %v3517_v54 }
 0x5a6   : > { %v3521_v57 = vpop.eup %3520  ;;  %v1873_v59 = vadd.f32 1.0, %v3519_v56  ;;  %3522 = vrcp.f32 %v1874_v55 }
 0x5a7   : > { %v1898_v43 = vsel %vm311_vm3, %v1897_v41, %v1896_v42  ;;  %v1876_v60 = vadd.f32 1.0, %v3521_v57  ;;  %3524 = vrcp.f32 %v1875_v58 }
 0x5a8   : > { %3131 = vmatmul.mubr.msk.f32.vlgmr.msra.gmra.mrb[14].mxu1 %vm313_vm4, %v1898_v43  ;;  %3526 = vrcp.f32 %v1873_v59 }
 0x5a9   : > { %3144 = vmatprep.mubr.msk.f32.mxu1 %vm3620_vm0, %v3621_v4  ;;  %3528 = vrcp.f32 %v1876_v60 }
 0x5b0   : > { %v3523_v61 = vpop.eup %3522 }
 0x5b1   : > { %v3525_v62 = vpop.eup %3524  ;;  %v1886_v46 = vmul.f32 %v3523_v61, %v1830_v44 }
 0x5b2   : > { %v3527_v0 = vpop.eup %3526  ;;  %v1887_v6 = vmul.f32 %v3525_v62, %v1831_v45  ;;  %v2146_v62 = vld [vmem:[%s3698_s26 + $0x1d] sm:$0x1] }
 0x5b3   : > { %v3529_v5 = vpop.eup %3528  ;;  %v1885_v8 = vmul.f32 %v3527_v0, %v1829_v47  ;;  %v1975_v9 = vrot.slane %v1886_v46, 7  ;;  %v2147_v46 = vld [vmem:[%s3698_s26 + $0x2d] sm:$0x1]  ;;  %v2929_v0 = vmul.f32 -1.442695, %v2146_v62 }
 0x5b4   : > { %v1888_v13 = vmul.f32 %v3529_v5, %v1832_v48  ;;  %v1977_v17 = vrot.slane %v1887_v6, 6  ;;  %v2145_v5 = vld [vmem:[%s3698_s26 + $0xd] sm:$0x1]  ;;  %v2148_v6 = vld [vmem:[%s3698_s26 + $0x3d] sm:$0x1] }
 0x5b5   : > { %v1976_v19 = vsel %vm305_vm1, %v1975_v9, %v1885_v8  ;;  %v2928_v8 = vmul.f32 -1.442695, %v2145_v5  ;;  %v2931_v9 = vmul.f32 -1.442695, %v2148_v6 }
 0x5b6   : > { %v1979_v20 = vrot.slane %v1888_v13, 5  ;;  %v1978_v21 = vsel %vm308_vm2, %v1977_v17, %v1976_v19 }
 0x661   : > { %v3882_v23 = vpop.f32.mrb[10].mxu1 }
 0x662   : > { %v3104_v24 = vpop.f32.mrb[11].mxu1 }
 0x663   : > { %v2142_v24 = vld [vmem:[%s3698_s26 + $0x1c] sm:$0x1] }
 0x664   : > { %v2925_v29 = vmul.f32 -1.442695, %v2142_v24 }
 0x665   : > { %v1733_v25 = vpop.f32.mrb[12].mxu1 }
 0x666   : > { %v1738_v27 = vrot.slane %v1733_v25, 4  ;;  %v3118_v28 = vpop.f32.mrb[13].mxu1  ;;  %v2141_v25 = vld [vmem:[%s3698_s26 + $0xc] sm:$0x1] }
 0x667   : > { %v2924_v28 = vmul.f32 -1.442695, %v2141_v25 }
 0x668   : > { %v3317_v31 = vpack.i.bf16 %v3876_v63, %v1738_v27 }
 0x669   : > { %3530 = vpow2.f32 %v2924_v28 }
 0x66a   : > { %3318 = vrot.lane.b32.xlu0 %v3317_v31, %s3622_s27  ;;  %3532 = vpow2.f32 %v2925_v29 }
 0x66b   : > { %3534 = vpow2.f32 %v2926_v16 }
 0x673   : > { %v3531_v32 = vpop.eup %3530 }
 0x674   : > { %v3533_v33 = vpop.eup %3532  ;;  %v2161_v35 = vadd.f32 1.0, %v3531_v32 }
 0x675   : > { %v3535_v36 = vpop.eup %3534  ;;  %v2162_v37 = vadd.f32 1.0, %v3533_v33 }
 0x676   : > { %v2163_v39 = vadd.f32 1.0, %v3535_v36 }
 0x67b   : > { %v3914_v22 = vpop.f32.mrb[14].mxu1 }
 0x6dc   : > { %v3319_v7 = vpop.permute.xlu0 %3318 }
 0x6dd   : > { %v3321_v10 = vunpack.i.h.bf16 %v3319_v7  ;;  %v3320_v11 = vunpack.i.l.bf16 %v3319_v7  ;;  %v2930_v7 = vmul.f32 -1.442695, %v2147_v46 }
 0x6df   : > { %v1748_v14 = vsel %vm478_vm5, %v3321_v10, %v1738_v27  ;;  %v1747_v15 = vsel %vm478_vm5, %v3876_v63, %v3320_v11  ;;  %v1980_v63 = vsel %vm311_vm3, %v1979_v20, %v1978_v21  ;;  %v2144_v27 = vld [vmem:[%s3698_s26 + $0x3c] sm:$0x1] }
 0x6e0   : > { %v3232_v18 = vpack.c.bf16 %v1748_v14, %v1747_v15  ;;  %v2927_v31 = vmul.f32 -1.442695, %v2144_v27 }
 0x6e2   : > { %3233 = vmatpush3.bf16.msra.mxu0 %v3232_v18  ;;  %3536 = vpow2.f32 %v2927_v31 }
 0x6e3   : > { %3237 = vmatprep.subr.bf16.mxu0 %v3619_v2  ;;  %3538 = vrcp.f32 %v2161_v35 }
 0x6e4   : > { %3540 = vrcp.f32 %v2162_v37 }
 0x6e5   : > { %3124 = vmatmul.mubr.msk.f32.vlgmr.msra.gmra.mrb[14].mxu0 %vm313_vm4, %v3746_v12  ;;  %v3132_v12 = vpop.f32.mrb[15].mxu1  ;;  %3542 = vrcp.f32 %v2163_v39 }
 0x6e6   : > { %3239 = vmatpush3.bf16.msra.mxu0 %v3682_v3  ;;  %3137 = vmatprep.mubr.msk.f32.mxu0 %vm3620_vm0, %v3621_v4 }
 0x6e7   : > { %3243 = vmatprep.subr.bf16.mxu0 %v3619_v2 }
 0x6e9   : > { %3138 = vmatmul.mubr.msk.f32.vlgmr.msra.gmra.mrb[16].mxu0 %vm313_vm4, %v1980_v63 }
 0x6ea   : > { %3245 = vmatpush3.bf16.msra.mxu0 %v3682_v3  ;;  %3151 = vmatprep.mubr.msk.f32.mxu0 %vm3620_vm0, %v3621_v4 }
 0x6eb   : > { %3249 = vmatprep.subr.bf16.mxu0 %v3619_v2 }
 0x6ec   : > { %v3537_v38 = vpop.eup %3536 }
 0x6ed   : > { %v2164_v40 = vadd.f32 1.0, %v3537_v38  ;;  %v3539_v44 = vpop.eup %3538 }
 0x6ee   : > { %v3541_v47 = vpop.eup %3540  ;;  %v2173_v51 = vmul.f32 %v3539_v44, %v2141_v25 }
 0x6ef   : > { %3544 = vrcp.f32 %v2164_v40  ;;  %v3543_v48 = vpop.eup %3542  ;;  %v2174_v52 = vmul.f32 %v3541_v47, %v2142_v24  ;;  %v3943_v40 = vld [vmem:[%s4028_s1] sm:$0xff]  ;;  %v2459_v47 = vld [vmem:[%s3698_s26 + $0x2e] sm:$0x1] }
 0x6f0   : > { %v2175_v54 = vmul.f32 %v3543_v48, %v2143_v26  ;;  %3546 = vpow2.f32 %v2929_v0  ;;  %v2460_v48 = vld [vmem:[%s3698_s26 + $0x3e] sm:$0x1] }
 0x6f1   : > { %v2209_v56 = vrot.slane %v2174_v52, 7  ;;  %3548 = vpow2.f32 %v2930_v7  ;;  %v2937_v52 = vmul.f32 -1.442695, %v2459_v47 }
 0x6f2   : > { %v2211_v57 = vrot.slane %v2175_v54, 6  ;;  %3550 = vpow2.f32 %v2928_v8 }
 0x6f3   : > { %v2210_v58 = vsel %vm305_vm1, %v2209_v56, %v2173_v51  ;;  %3552 = vpow2.f32 %v2931_v9 }
 0x6f4   : > { %v2212_v60 = vsel %vm308_vm2, %v2211_v57, %v2210_v58 }
 0x6f9   : > { %v3545_v53 = vpop.eup %3544 }
 0x6fa   : > { %v2176_v55 = vmul.f32 %v3545_v53, %v2144_v27  ;;  %v3547_v10 = vpop.eup %3546  ;;  %v2938_v53 = vmul.f32 -1.442695, %v2460_v48 }
 0x6fb   : > { %v3549_v11 = vpop.eup %3548  ;;  %v2190_v13 = vadd.f32 1.0, %v3547_v10 }
 0x6fc   : > { %v2213_v59 = vrot.slane %v2176_v55, 5  ;;  %v3551_v14 = vpop.eup %3550  ;;  %v2191_v17 = vadd.f32 1.0, %v3549_v11 }
 0x6fd   : > { %v3553_v15 = vpop.eup %3552  ;;  %v2189_v18 = vadd.f32 1.0, %v3551_v14  ;;  %3554 = vrcp.f32 %v2190_v13 }
 0x6fe   : > { %v2214_v61 = vsel %vm311_vm3, %v2213_v59, %v2212_v60  ;;  %v2192_v19 = vadd.f32 1.0, %v3553_v15  ;;  %3556 = vrcp.f32 %v2191_v17 }
 0x6ff   : > { %3152 = vmatmul.mubr.msk.f32.vlgmr.msra.gmra.mrb[18].mxu0 %vm313_vm4, %v2214_v61  ;;  %3558 = vrcp.f32 %v2189_v18 }
 0x700   : > { %3165 = vmatprep.mubr.msk.f32.mxu0 %vm3620_vm0, %v3621_v4  ;;  %3560 = vrcp.f32 %v2192_v19  ;;  %v235_v19 = vld [vmem:[%s4029_s2] sm:$0xff] }
 0x707   : > { %v3555_v20 = vpop.eup %3554 }
 0x708   : > { %v3557_v21 = vpop.eup %3556  ;;  %v2202_v63 = vmul.f32 %v3555_v20, %v2146_v62 }
 0x709   : > { %v3559_v12 = vpop.eup %3558  ;;  %v2203_v25 = vmul.f32 %v3557_v21, %v2147_v46 }
 0x70a   : > { %v3561_v24 = vpop.eup %3560  ;;  %v2201_v27 = vmul.f32 %v3559_v12, %v2145_v5  ;;  %v2291_v28 = vrot.slane %v2202_v63, 7 }
 0x70b   : > { %v2204_v31 = vmul.f32 %v3561_v24, %v2148_v6  ;;  %v2293_v35 = vrot.slane %v2203_v25, 6  ;;  %v2462_v25 = vld [vmem:[%s3698_s26 + $0x1f] sm:$0x1] }
 0x70c   : > { %v2292_v37 = vsel %vm305_vm1, %v2291_v28, %v2201_v27  ;;  %v2940_v27 = vmul.f32 -1.442695, %v2462_v25  ;;  %v2461_v28 = vld [vmem:[%s3698_s26 + $0xf] sm:$0x1] }
 0x70d   : > { %v2295_v38 = vrot.slane %v2204_v31, 5  ;;  %v2294_v39 = vsel %vm308_vm2, %v2293_v35, %v2292_v37  ;;  %v2939_v31 = vmul.f32 -1.442695, %v2461_v28 }
 0x7b8   : > { %v3920_v41 = vpop.f32.mrb[14].mxu0 }
 0x7b9   : > { %v3125_v42 = vpop.f32.mrb[15].mxu0 }
 0x7bc   : > { %v2049_v43 = vpop.f32.mrb[16].mxu0 }
 0x7bd   : > { %v2054_v45 = vrot.slane %v2049_v43, 4  ;;  %v3139_v30 = vpop.f32.mrb[17].mxu0  ;;  %v3623_v43 = vmov 0  }
 0x7be   : > { %3337 = vset.pattern.permute.xlu0 %v3623_v43  ;;  %v2457_v30 = vld [vmem:[%s3698_s26 + $0xe] sm:$0x1] }
 0x7bf   : > { %v3322_v50 = vpack.i.bf16 %v3914_v22, %v2054_v45 }
 0x7c1   : > { %3323 = vrot.lane.b32.xlu1 %v3322_v50, %s3622_s27  ;;  %v2935_v50 = vmul.f32 -1.442695, %v2457_v30 }
 0x7c3   : > { %3562 = vpow2.f32 %v2935_v50 }
 0x7cd   : > { %v3563_v54 = vpop.eup %3562 }
 0x7ce   : > { %v2477_v56 = vadd.f32 1.0, %v3563_v54 }
 0x7d2   : > { %v3957_v42 = vpop.f32.mrb[18].mxu0 }
 0x7d3   : > { %v3153_v44 = vpop.f32.mrb[19].mxu0 }
 0x833   : > { %v3324_v26 = vpop.permute.xlu1 %3323 }
 0x834   : > { %v3326_v29 = vunpack.i.h.bf16 %v3324_v26  ;;  %v3325_v16 = vunpack.i.l.bf16 %v3324_v26  ;;  %v2463_v26 = vld [vmem:[%s3698_s26 + $0x2f] sm:$0x1] }
 0x836   : > { %v2064_v32 = vsel %vm478_vm5, %v3326_v29, %v2054_v45  ;;  %v2063_v33 = vsel %vm478_vm5, %v3914_v22, %v3325_v16  ;;  %v2296_v22 = vsel %vm311_vm3, %v2295_v38, %v2294_v39  ;;  %v2458_v45 = vld [vmem:[%s3698_s26 + $0x1e] sm:$0x1]  ;;  %v2464_v29 = vld [vmem:[%s3698_s26 + $0x3f] sm:$0x1]  ;;  %v2941_v16 = vmul.f32 -1.442695, %v2463_v26 }
 0x837   : > { %v3241_v36 = vpack.c.bf16 %v2064_v32, %v2063_v33  ;;  %v2936_v51 = vmul.f32 -1.442695, %v2458_v45  ;;  %v2942_v32 = vmul.f32 -1.442695, %v2464_v29 }
 0x839   : > { %3242 = vmatpush3.bf16.msra.mxu1 %v3241_v36  ;;  %3564 = vpow2.f32 %v2936_v51 }
 0x83a   : > { %3246 = vmatprep.subr.bf16.mxu1 %v3619_v2  ;;  %3566 = vpow2.f32 %v2937_v52 }
 0x83b   : > { %3568 = vpow2.f32 %v2938_v53 }
 0x83c   : > { %3145 = vmatmul.mubr.msk.f32.vlgmr.msra.gmra.mrb[16].mxu1 %vm313_vm4, %v3943_v40  ;;  %3570 = vrcp.f32 %v2477_v56 }
 0x83d   : > { %3248 = vmatpush3.bf16.msra.mxu1 %v3682_v3  ;;  %3158 = vmatprep.mubr.msk.f32.mxu1 %vm3620_vm0, %v3621_v4 }
 0x83e   : > { %3252 = vmatprep.subr.bf16.mxu1 %v3619_v2 }
 0x840   : > { %3159 = vmatmul.mubr.msk.f32.vlgmr.msra.gmra.mrb[18].mxu1 %vm313_vm4, %v2296_v22 }
 0x841   : > { %3254 = vmatpush3.bf16.msra.mxu1 %v3682_v3  ;;  %3172 = vmatprep.mubr.msk.f32.mxu1 %vm3620_vm0, %v3621_v4 }
 0x842   : > { %3258 = vmatprep.subr.bf16.mxu1 %v3619_v2 }
 0x843   : > { %v3565_v55 = vpop.eup %3564 }
 0x844   : > { %v3567_v57 = vpop.eup %3566  ;;  %v2478_v58 = vadd.f32 1.0, %v3565_v55 }
 0x845   : > { %v3569_v59 = vpop.eup %3568  ;;  %v2479_v60 = vadd.f32 1.0, %v3567_v57 }
 0x846   : > { %v2480_v61 = vadd.f32 1.0, %v3569_v59  ;;  %3572 = vrcp.f32 %v2478_v58  ;;  %v3571_v5 = vpop.eup %3570 }
 0x847   : > { %3574 = vrcp.f32 %v2479_v60  ;;  %v2489_v11 = vmul.f32 %v3571_v5, %v2457_v30 }
 0x848   : > { %3576 = vrcp.f32 %v2480_v61 }
 0x849   : > { %3578 = vpow2.f32 %v2940_v27 }
 0x84a   : > { %3580 = vpow2.f32 %v2941_v16 }
 0x84b   : > { %3582 = vpow2.f32 %v2939_v31 }
 0x84c   : > { %3584 = vpow2.f32 %v2942_v32 }
 0x850   : > { %v3573_v8 = vpop.eup %3572 }
 0x851   : > { %v3575_v9 = vpop.eup %3574  ;;  %v2490_v13 = vmul.f32 %v3573_v8, %v2458_v45 }
 0x852   : > { %v3577_v14 = vpop.eup %3576  ;;  %v2491_v15 = vmul.f32 %v3575_v9, %v2459_v47 }
 0x853   : > { %v2492_v17 = vmul.f32 %v3577_v14, %v2460_v48  ;;  %v2525_v18 = vrot.slane %v2490_v13, 7  ;;  %v3579_v33 = vpop.eup %3578 }
 0x854   : > { %v2527_v20 = vrot.slane %v2491_v15, 6  ;;  %v3581_v35 = vpop.eup %3580  ;;  %v2506_v36 = vadd.f32 1.0, %v3579_v33 }
 0x855   : > { %v2526_v21 = vsel %vm305_vm1, %v2525_v18, %v2489_v11  ;;  %v2529_v63 = vrot.slane %v2492_v17, 5  ;;  %v3583_v37 = vpop.eup %3582  ;;  %v2507_v39 = vadd.f32 1.0, %v3581_v35 }
 0x856   : > { %v2528_v12 = vsel %vm308_vm2, %v2527_v20, %v2526_v21  ;;  %v3585_v38 = vpop.eup %3584  ;;  %v2505_v22 = vadd.f32 1.0, %v3583_v37  ;;  %3586 = vrcp.f32 %v2506_v36 }
 0x857   : > { %v2530_v24 = vsel %vm311_vm3, %v2529_v63, %v2528_v12  ;;  %v2508_v43 = vadd.f32 1.0, %v3585_v38  ;;  %3588 = vrcp.f32 %v2507_v39 }
 0x858   : > { %3173 = vmatmul.mubr.msk.f32.vlgmr.msra.gmra.mrb[20].mxu1 %vm313_vm4, %v2530_v24  ;;  %3590 = vrcp.f32 %v2505_v22 }
 0x859   : > { %3186 = vmatprep.mubr.msk.f32.mxu1 %vm3620_vm0, %v3621_v4  ;;  %3592 = vrcp.f32 %v2508_v43 }
 0x860   : > { %v3587_v44 = vpop.eup %3586 }
 0x861   : > { %v3589_v45 = vpop.eup %3588  ;;  %v2518_v30 = vmul.f32 %v3587_v44, %v2462_v25 }
 0x862   : > { %v3591_v47 = vpop.eup %3590  ;;  %v2519_v50 = vmul.f32 %v3589_v45, %v2463_v26 }
 0x863   : > { %v3593_v48 = vpop.eup %3592  ;;  %v2517_v52 = vmul.f32 %v3591_v47, %v2461_v28  ;;  %v2607_v53 = vrot.slane %v2518_v30, 7 }
 0x864   : > { %v2520_v56 = vmul.f32 %v3593_v48, %v2464_v29  ;;  %v2609_v59 = vrot.slane %v2519_v50, 6 }
 0x865   : > { %v2608_v61 = vsel %vm305_vm1, %v2607_v53, %v2517_v52 }
 0x90f   : > { %v3963_v62 = vpop.f32.mrb[16].mxu1 }
 0x910   : > { %v3146_v46 = vpop.f32.mrb[17].mxu1 }
 0x911   : > { %v2611_v46 = vrot.slane %v2520_v56, 5 }
 0x913   : > { %v2365_v0 = vpop.f32.mrb[18].mxu1 }
 0x914   : > { %v2370_v6 = vrot.slane %v2365_v0, 4  ;;  %v3160_v7 = vpop.f32.mrb[19].mxu1  ;;  %v2610_v0 = vsel %vm308_vm2, %v2609_v59, %v2608_v61 }
 0x916   : > { %v3327_v10 = vpack.i.bf16 %v3957_v42, %v2370_v6 }
 0x918   : > { %3328 = vrot.lane.b32.xlu0 %v3327_v10, %s3622_s27 }
 0x91c   : > { %483 = vperm.xlu0 %3337, %v235_v19  }
 0x98a   : > { %v3329_v51 = vpop.permute.xlu0 %3328 }
 0x98b   : > { %v3331_v54 = vunpack.i.h.bf16 %v3329_v51  ;;  %v3330_v55 = vunpack.i.l.bf16 %v3329_v51 }
 0x98d   : > { %v2380_v57 = vsel %vm478_vm5, %v3331_v54, %v2370_v6  ;;  %v2379_v58 = vsel %vm478_vm5, %v3957_v42, %v3330_v55  ;;  %v2612_v42 = vsel %vm311_vm3, %v2611_v46, %v2610_v0 }
 0x98e   : > { %v3250_v60 = vpack.c.bf16 %v2380_v57, %v2379_v58 }
 0x990   : > { %3251 = vmatpush3.bf16.msra.mxu0 %v3250_v60 }
 0x991   : > { %3255 = vmatprep.subr.bf16.mxu0 %v3619_v2 }
 0x993   : > { %3166 = vmatmul.mubr.msk.f32.vlgmr.msra.gmra.mrb[20].mxu0 %vm313_vm4, %v3943_v40 }
 0x994   : > { %3257 = vmatpush3.bf16.msra.mxu0 %v3682_v3  ;;  %3179 = vmatprep.mubr.msk.f32.mxu0 %vm3620_vm0, %v3621_v4  ;;  %v2599_v4 = vpop.f32.mrb[20].mxu1 }
 0x995   : > { %v3174_v7 = vpop.f32.mrb[21].mxu1 }
 0x997   : > { %3180 = vmatmul.mubr.msk.f32.vlgmr.msra.gmra.mrb[22].mxu0 %vm313_vm4, %v2612_v42 }
 0x99b   : > { %v484_v5 = vpop.permute.xlu0 %483 }
 0x99c   : > { %v1500_v6 = vadd.f32 %v3882_v23, %v484_v5  ;;  %v556_v2 = vadd.f32 %v3768_v34, %v484_v5  ;;  %v2132_v3 = vadd.f32 %v3963_v62, %v484_v5  ;;  %v868_v14 = vadd.f32 %v3806_v49, %v484_v5 }
 0x99d   : > { %v1184_v34 = vadd.f32 %v3844_v1, %v484_v5  ;;  %v1816_v62 = vadd.f32 %v3920_v41, %v484_v5 }
 0x99e   : > { %1504 = vrot.lane.b32.xlu0 %v1500_v6, %s3624_s12  ;;  %560 = vst.msk [vmem:[%s3998_s11] sm:$0xff] %vm559_vm6, %v556_v2 }
 0x9a2   : > { %2136 = vrot.lane.b32.xlu0 %v2132_v3, %s3625_s13 }
 0xa10   : > { %v1505_v41 = vpop.permute.xlu0 %1504 }
 0xa14   : > { %v2137_v24 = vpop.permute.xlu0 %2136 }
 0xa66   : > { %v2447_v8 = vpop.f32.mrb[20].mxu0 }
 0xa67   : > { %v3167_v23 = vpop.f32.mrb[21].mxu0  ;;  %v2448_v15 = vadd.f32 %v2447_v8, %v484_v5 }
 0xa6a   : > { %v2681_v9 = vpop.f32.mrb[22].mxu0 }
 0xa6b   : > { %v2686_v10 = vrot.slane %v2681_v9, 4  ;;  %v3181_v11 = vpop.f32.mrb[23].mxu0 }
 0xa6d   : > { %v3332_v13 = vpack.i.bf16 %v2599_v4, %v2686_v10 }
 0xa6f   : > { %3333 = vrot.lane.b32.xlu1 %v3332_v13, %s3622_s27 }
 0xa73   : > { %872 = vrot.lane.b32.xlu1 %v868_v14, %s3626_s14 }
 0xa77   : > { %1188 = vrot.lane.b32.xlu1 %v1184_v34, %s3627_s15 }
 0xa7b   : > { %1820 = vrot.lane.b32.xlu1 %v1816_v62, %s3628_s19 }
 0xa7f   : > { %2452 = vrot.lane.b32.xlu1 %v2448_v15, %s3629_s20 }
 0xae1   : > { %v3334_v17 = vpop.permute.xlu1 %3333 }
 0xae2   : > { %v3336_v18 = vunpack.i.h.bf16 %v3334_v17  ;;  %v3335_v19 = vunpack.i.l.bf16 %v3334_v17 }
 0xae4   : > { %v2696_v49 = vsel %vm478_vm5, %v3336_v18, %v2686_v10  ;;  %v2695_v1 = vsel %vm478_vm5, %v2599_v4, %v3335_v19 }
 0xae5   : > { %v3259_v20 = vpack.c.bf16 %v2696_v49, %v2695_v1  ;;  %v873_v21 = vpop.permute.xlu1 %872 }
 0xae6   : > { %876 = vst.msk [vmem:[%s3998_s11] sm:$0xff] %vm875_vm7, %v873_v21 }
 0xae7   : > { %3260 = vmatpush3.bf16.msra.mxu1 %v3259_v20 }
 0xae9   : > { %v1189_v63 = vpop.permute.xlu1 %1188 }
 0xaea   : > { %1192 = vst.msk [vmem:[%s3998_s11] sm:$0xff] %vm1191_vm8, %v1189_v63  ;;  %3187 = vmatmul.mubr.msk.f32.vlgmr.msra.gmra.mrb[22].mxu1 %vm313_vm4, %v3943_v40 }
 0xaeb   : > { %1508 = vst.msk [vmem:[%s3998_s11] sm:$0xff] %vm1507_vm9, %v1505_v41 }
 0xaed   : > { %v1821_v12 = vpop.permute.xlu1 %1820 }
 0xaee   : > { %1824 = vst.msk [vmem:[%s3998_s11] sm:$0xff] %vm1823_vm10, %v1821_v12 }
 0xaef   : > { %2140 = vst.msk [vmem:[%s3998_s11] sm:$0xff] %vm2139_vm11, %v2137_v24 }
 0xaf1   : > { %v2453_v25 = vpop.permute.xlu1 %2452 }
 0xaf2   : > { %2456 = vst.msk [vmem:[%s3998_s11] sm:$0xff] %vm2455_vm12, %v2453_v25 }
 0xbbd   : > { %v2763_v26 = vpop.f32.mrb[22].mxu1 }
 0xbbe   : > { %v2764_v27 = vadd.f32 %v2763_v26, %v484_v5  ;;  %v3188_v28 = vpop.f32.mrb[23].mxu1 }
 0xbc0   : > { %2768 = vrot.lane.b32.xlu0 %v2764_v27, %s3630_s21 }
 0xc32   : > { %v2769_v29 = vpop.permute.xlu0 %2768 }
 0xc33   : > { %2772 = vst.msk [vmem:[%s3998_s11] sm:$0xff] %vm2771_vm13, %v2769_v29 }
 0xc34 PF: > { %s14_s17 = sadd.s32 1, %s3617_s17   ;;  %s4032_s15 = smov %s3613_s16 }
 0xc35   : > { %p11_p5 = scmp.ge.s32.totalorder %s14_s17, 4   ;;  %s4033_s16 = smov %s4035_s18 }
 0xc37   :  { %13 = sbr.rel (!%p11_p5) target bundleno = 2 (0x2), region = 66 }

</bundles_post_ra>
